<compile_context>
chip_gen: v6e
topology: v6e:2x2x1
jax: 0.10.0
libtpu: 0.0.40
codegen_flags: <defaults>
</compile_context>

<pallas_src>
import jax
import jax.numpy as jnp
from jax.experimental import pallas as pl
from jax.experimental.pallas import tpu as pltpu


def _round_up(n: int, m: int) -> int:
    return ((n + m - 1) // m) * m


# -----------------------------------------------------------------------------
# Kernel
# -----------------------------------------------------------------------------
def qnetwork_kernel(x_ref, w1_ref, b1_ref, w2_ref, b2_ref, w3_ref, b3_ref, out_ref):
    # In-kernel cast of the streamed activations to the MXU operand dtype
    # (bf16 on the perf path); accumulation is always f32.
    x = x_ref[...].astype(w1_ref.dtype)

    # fc1 + ReLU (bias add / ReLU kept in f32).
    h1 = jnp.dot(x, w1_ref[...], preferred_element_type=jnp.float32)
    h1 = jnp.maximum(h1 + b1_ref[...], 0.0)

    # fc2 + ReLU
    h2 = jnp.dot(h1.astype(w2_ref.dtype), w2_ref[...],
                 preferred_element_type=jnp.float32)
    h2 = jnp.maximum(h2 + b2_ref[...], 0.0)

    # fc3 (no activation). w3/b3 are lane-padded to a multiple of 128 so this is a
    # full-lane, unmasked store; out dtype is bf16 on the perf path to halve writes.
    q = jnp.dot(h2.astype(w3_ref.dtype), w3_ref[...],
                preferred_element_type=jnp.float32)
    out_ref[...] = (q + b3_ref[...]).astype(out_ref.dtype)


# -----------------------------------------------------------------------------
# One-time parameter preparation (hoisted out of the per-call hot path)
# -----------------------------------------------------------------------------
def prepare_params(params, *, use_bf16: bool = True):
    """Pads w3/b3 to 128 output lanes and casts weights to the MXU operand dtype.

    Run ONCE (outside the actor/training hot loop). Weights are stored as
    [in_features, out_features] so the kernel computes y = x @ W + b.
    """
    w_dtype = jnp.bfloat16 if use_bf16 else jnp.float32
    w1, b1 = params["w1"], params["b1"]
    w2, b2 = params["w2"], params["b2"]
    w3, b3 = params["w3"], params["b3"]

    A = w3.shape[1]
    A_pad = _round_up(A, 128)
    w3 = jnp.pad(w3, ((0, 0), (0, A_pad - A)))
    b3 = jnp.pad(b3, ((0, 0), (0, A_pad - A)))  # zero pad: fine because we slice,
    # (use a large-negative pad instead if an in-kernel argmax is ever added).

    return {
        "w1": w1.astype(w_dtype), "b1": b1.astype(jnp.float32),
        "w2": w2.astype(w_dtype), "b2": b2.astype(jnp.float32),
        "w3": w3.astype(w_dtype), "b3": b3.astype(jnp.float32),
        "action_size": A,
        "out_dtype": jnp.bfloat16 if use_bf16 else jnp.float32,
    }


# -----------------------------------------------------------------------------
# Forward wrapper
# -----------------------------------------------------------------------------
def qnetwork_forward(x, prepared, *, block_b: int = 2048,
                     core_parallel: bool = False,
                     single_buffer_weights: bool = True):
    """x: [B, state_size] float32. prepared: output of prepare_params()."""
    w1, b1 = prepared["w1"], prepared["b1"]
    w2, b2 = prepared["w2"], prepared["b2"]
    w3, b3 = prepared["w3"], prepared["b3"]
    A = prepared["action_size"]
    out_dtype = prepared["out_dtype"]

    B, S = x.shape
    H = w1.shape[1]
    A_pad = w3.shape[1]

    x_bytes = jnp.dtype(x.dtype).itemsize
    out_bytes = jnp.dtype(out_dtype).itemsize
    weight_bytes = sum(int(a.size) * jnp.dtype(a.dtype).itemsize
                       for a in (w1, b1, w2, b2, w3, b3))

    # --- Batch tiling: big tiles amortize the ~0.35us/step overhead. Cap against a
    # conservative VMEM budget (double-buffered x + out, plus resident weights) so
    # very large block_b never OOMs v5e's 16 MiB / v7x's 32 MiB scoped defaults. ---
    vmem_budget = 12 * 1024 * 1024
    per_row = 2 * (S * x_bytes + A_pad * out_bytes)   # double-buffered streams
    max_tb = max(8, ((vmem_budget - weight_bytes) // per_row) // 8 * 8)
    tb = min(block_b, max_tb, _round_up(B, 8))
    B_pad = _round_up(B, tb)
    if B_pad != B:
        # Padded rows produce garbage after bias+ReLU but are sliced off below;
        # never consume them in-kernel without masking.
        x = jnp.pad(x, ((0, B_pad - B), (0, 0)))
    grid = (B_pad // tb,)

    # v7x: CORE_PARALLEL actually shards the batch tiles across the 2 TensorCores;
    # the plain PARALLEL hint is a no-op on single-TC v5e/v6e.
    sem = pltpu.CORE_PARALLEL if core_parallel else pltpu.PARALLEL

    cost = pl.CostEstimate(
        flops=2 * B_pad * (S * H + H * H + H * A_pad),
        transcendentals=0,
        bytes_accessed=B_pad * S * x_bytes + weight_bytes + B_pad * A_pad * out_bytes,
    )

    def build(weight_pipeline_mode):
        wkw = ({} if weight_pipeline_mode is None
               else {"pipeline_mode": weight_pipeline_mode})
        in_specs = [
            # Activations stream over the batch grid axis (double-buffered DMA).
            pl.BlockSpec((tb, S), lambda i: (i, 0)),
            # Weights/biases: constant block index -> VMEM-resident across steps.
            pl.BlockSpec((S, H), lambda i: (0, 0), **wkw),
            pl.BlockSpec((1, H), lambda i: (0, 0), **wkw),
            pl.BlockSpec((H, H), lambda i: (0, 0), **wkw),
            pl.BlockSpec((1, H), lambda i: (0, 0), **wkw),
            pl.BlockSpec((H, A_pad), lambda i: (0, 0), **wkw),
            pl.BlockSpec((1, A_pad), lambda i: (0, 0), **wkw),
        ]
        return pl.pallas_call(
            qnetwork_kernel,
            out_shape=jax.ShapeDtypeStruct((B_pad, A_pad), out_dtype),
            grid_spec=pltpu.PrefetchScalarGridSpec(
                num_scalar_prefetch=0,
                grid=grid,
                in_specs=in_specs,
                out_specs=pl.BlockSpec((tb, A_pad), lambda i: (i, 0)),
            ),
            compiler_params=pltpu.CompilerParams(dimension_semantics=(sem,)),
            cost_estimate=cost,
        )

    args = (x, w1, b1, w2, b2, w3, b3)
    if single_buffer_weights:
        try:
            # Never-refetched blocks don't need the second pipeline buffer.
            out = build(pl.Buffered(1))(*args)
        except Exception:
            out = build(None)(*args)
    else:
        out = build(None)(*args)

    # Strip batch padding and the 128-lane padding of the action dim.
    # TODO(synk): fuse this slice (or an argmax) into the consumer for actor loops.
    return out[:B, :A]


# -----------------------------------------------------------------------------
# Init + reference (for correctness check)
# -----------------------------------------------------------------------------
def init_params(key, state_size, action_size, hidden_size):
    """Deterministic init mirroring nn.Linear (U(-1/sqrt(fan_in), 1/sqrt(fan_in)))."""
    def linear(key, fan_in, fan_out):
        k_w, k_b = jax.random.split(key)
        bound = 1.0 / jnp.sqrt(fan_in)
        # stored as [in, out] (transpose of PyTorch's [out, in]) for x @ W
        w = jax.random.uniform(k_w, (fan_in, fan_out), jnp.float32, -bound, bound)
        b = jax.random.uniform(k_b, (1, fan_out), jnp.float32, -bound, bound)
        return w, b

    k1, k2, k3 = jax.random.split(key, 3)
    w1, b1 = linear(k1, state_size, hidden_size)
    w2, b2 = linear(k2, hidden_size, hidden_size)
    w3, b3 = linear(k3, hidden_size, action_size)
    return {"w1": w1, "b1": b1, "w2": w2, "b2": b2, "w3": w3, "b3": b3}


def reference_forward(x, p):
    h1 = jnp.maximum(x @ p["w1"] + p["b1"], 0.0)
    h2 = jnp.maximum(h1 @ p["w2"] + p["b2"], 0.0)
    return h2 @ p["w3"] + p["b3"]


if __name__ == "__main__":
    key = jax.random.PRNGKey(0)
    k_param, k_x = jax.random.split(key)

    # Small feature dims consistent with the DQN module; batch chosen so both the
    # batch-padding path (250 -> 256) and the multi-step grid path are exercised.
    batch = 250
    state_size = 16
    hidden_size = 32
    action_size = 4

    params = init_params(k_param, state_size, action_size, hidden_size)
    x = jax.random.normal(k_x, (batch, state_size), jnp.float32)

    ref = reference_forward(x, params)

    # f32 MXU path, single grid step (default block_b): tight check.
    prep_f32 = prepare_params(params, use_bf16=False)
    out_f32 = jax.block_until_ready(qnetwork_forward(x, prep_f32))
    assert out_f32.shape == (batch, action_size)
    assert jnp.allclose(out_f32, ref, atol=1e-4, rtol=1e-4), "f32 mismatch vs reference"

    # f32 path with a small tile -> 2 grid steps: validates the pipelined grid.
    out_multi = jax.block_until_ready(qnetwork_forward(x, prep_f32, block_b=128))
    assert out_multi.shape == (batch, action_size)
    assert jnp.allclose(out_multi, ref, atol=1e-4, rtol=1e-4), "multi-step mismatch"

    # bf16 MXU operands + bf16 lane-padded output (default perf path): loose check.
    prep_bf16 = prepare_params(params, use_bf16=True)
    out_bf16 = jax.block_until_ready(qnetwork_forward(x, prep_bf16))
    assert out_bf16.shape == (batch, action_size)
    assert jnp.allclose(out_bf16.astype(jnp.float32), ref, atol=1e-1, rtol=1e-1), \
        "bf16 mismatch vs reference"

    print("KERNEL_OK")
</pallas_src>

<mosaic_0001>
module attributes {stable_mosaic.version = 11 : i64} {
  func.func @qnetwork_kernel(%arg0: i32, %arg1: memref<256x16xf32, #tpu.memory_space<vmem>>, %arg2: memref<16x32xf32, #tpu.memory_space<vmem>>, %arg3: memref<1x32xf32, #tpu.memory_space<vmem>>, %arg4: memref<32x32xf32, #tpu.memory_space<vmem>>, %arg5: memref<1x32xf32, #tpu.memory_space<vmem>>, %arg6: memref<32x128xf32, #tpu.memory_space<vmem>>, %arg7: memref<1x128xf32, #tpu.memory_space<vmem>>, %arg8: memref<256x128xf32, #tpu.memory_space<vmem>>) attributes {dimension_semantics = [#tpu.dimension_semantics<parallel>], iteration_bounds = array<i64: 1>, scalar_prefetch = 0 : i64, scratch_operands = 0 : i64, tpu.core_type = #tpu.core_type<tc>, window_params = [{transform_indices = @transform_0, window_bounds = array<i64: 256, 16>}, {pipeline_mode = #tpu.pipeline_mode<synchronous>, transform_indices = @transform_1, window_bounds = array<i64: 16, 32>}, {pipeline_mode = #tpu.pipeline_mode<synchronous>, transform_indices = @transform_2, window_bounds = array<i64: 1, 32>}, {pipeline_mode = #tpu.pipeline_mode<synchronous>, transform_indices = @transform_3, window_bounds = array<i64: 32, 32>}, {pipeline_mode = #tpu.pipeline_mode<synchronous>, transform_indices = @transform_4, window_bounds = array<i64: 1, 32>}, {pipeline_mode = #tpu.pipeline_mode<synchronous>, transform_indices = @transform_5, window_bounds = array<i64: 32, 128>}, {pipeline_mode = #tpu.pipeline_mode<synchronous>, transform_indices = @transform_6, window_bounds = array<i64: 1, 128>}, {transform_indices = @transform_7, window_bounds = array<i64: 256, 128>}]} {
    %c0 = arith.constant 0 : index
    %c0_0 = arith.constant 0 : index
    %0 = vector.load %arg1[%c0, %c0_0] : memref<256x16xf32, #tpu.memory_space<vmem>>, vector<256x16xf32>
    %c0_1 = arith.constant 0 : index
    %c0_2 = arith.constant 0 : index
    %1 = vector.load %arg2[%c0_1, %c0_2] : memref<16x32xf32, #tpu.memory_space<vmem>>, vector<16x32xf32>
    %cst = arith.constant dense<0.000000e+00> : vector<256x32xf32>
    %2 = tpu.matmul %0, %1, %cst {dimension_numbers = #tpu.dot_dimension_numbers<[1], [0], [0], [1], [0, 0, 1, 1], [], []>} : vector<256x16xf32>, vector<16x32xf32>, vector<256x32xf32> -> vector<256x32xf32>
    %c0_3 = arith.constant 0 : index
    %c0_4 = arith.constant 0 : index
    %3 = vector.load %arg3[%c0_3, %c0_4] : memref<1x32xf32, #tpu.memory_space<vmem>>, vector<1x32xf32>
    %4 = vector.broadcast %3 : vector<1x32xf32> to vector<256x32xf32>
    %5 = arith.addf %2, %4 : vector<256x32xf32>
    %cst_5 = arith.constant 0.000000e+00 : f32
    %6 = vector.broadcast %cst_5 : f32 to vector<256x32xf32>
    %7 = arith.maximumf %5, %6 : vector<256x32xf32>
    %c0_6 = arith.constant 0 : index
    %c0_7 = arith.constant 0 : index
    %8 = vector.load %arg4[%c0_6, %c0_7] : memref<32x32xf32, #tpu.memory_space<vmem>>, vector<32x32xf32>
    %cst_8 = arith.constant dense<0.000000e+00> : vector<256x32xf32>
    %9 = tpu.matmul %7, %8, %cst_8 {dimension_numbers = #tpu.dot_dimension_numbers<[1], [0], [0], [1], [0, 0, 1, 1], [], []>} : vector<256x32xf32>, vector<32x32xf32>, vector<256x32xf32> -> vector<256x32xf32>
    %c0_9 = arith.constant 0 : index
    %c0_10 = arith.constant 0 : index
    %10 = vector.load %arg5[%c0_9, %c0_10] : memref<1x32xf32, #tpu.memory_space<vmem>>, vector<1x32xf32>
    %11 = vector.broadcast %10 : vector<1x32xf32> to vector<256x32xf32>
    %12 = arith.addf %9, %11 : vector<256x32xf32>
    %cst_11 = arith.constant 0.000000e+00 : f32
    %13 = vector.broadcast %cst_11 : f32 to vector<256x32xf32>
    %14 = arith.maximumf %12, %13 : vector<256x32xf32>
    %c0_12 = arith.constant 0 : index
    %c0_13 = arith.constant 0 : index
    %15 = vector.load %arg6[%c0_12, %c0_13] : memref<32x128xf32, #tpu.memory_space<vmem>>, vector<32x128xf32>
    %cst_14 = arith.constant dense<0.000000e+00> : vector<256x128xf32>
    %16 = tpu.matmul %14, %15, %cst_14 {dimension_numbers = #tpu.dot_dimension_numbers<[1], [0], [0], [1], [0, 0, 1, 1], [], []>} : vector<256x32xf32>, vector<32x128xf32>, vector<256x128xf32> -> vector<256x128xf32>
    %c0_15 = arith.constant 0 : index
    %c0_16 = arith.constant 0 : index
    %17 = vector.load %arg7[%c0_15, %c0_16] : memref<1x128xf32, #tpu.memory_space<vmem>>, vector<1x128xf32>
    %18 = vector.broadcast %17 : vector<1x128xf32> to vector<256x128xf32>
    %19 = arith.addf %16, %18 : vector<256x128xf32>
    %c0_17 = arith.constant 0 : index
    %c0_18 = arith.constant 0 : index
    %20 = vector.load %arg8[%c0_17, %c0_18] : memref<256x128xf32, #tpu.memory_space<vmem>>, vector<256x128xf32>
    tpu.vector_store %arg8[%c0_17, %c0_18], %19 {strides = array<i32>} : memref<256x128xf32, #tpu.memory_space<vmem>>, vector<256x128xf32>,
    return
  }
  func.func @transform_0(%arg0: i32) -> (i32, i32) {
    %c0_i32 = arith.constant 0 : i32
    %c0_i32_0 = arith.constant 0 : i32
    return %arg0, %c0_i32 : i32, i32
  }
  func.func @transform_1(%arg0: i32) -> (i32, i32) {
    %c0_i32 = arith.constant 0 : i32
    %c0_i32_0 = arith.constant 0 : i32
    %c0_i32_1 = arith.constant 0 : i32
    return %c0_i32, %c0_i32_0 : i32, i32
  }
  func.func @transform_2(%arg0: i32) -> (i32, i32) {
    %c0_i32 = arith.constant 0 : i32
    %c0_i32_0 = arith.constant 0 : i32
    %c0_i32_1 = arith.constant 0 : i32
    return %c0_i32, %c0_i32_0 : i32, i32
  }
  func.func @transform_3(%arg0: i32) -> (i32, i32) {
    %c0_i32 = arith.constant 0 : i32
    %c0_i32_0 = arith.constant 0 : i32
    %c0_i32_1 = arith.constant 0 : i32
    return %c0_i32, %c0_i32_0 : i32, i32
  }
  func.func @transform_4(%arg0: i32) -> (i32, i32) {
    %c0_i32 = arith.constant 0 : i32
    %c0_i32_0 = arith.constant 0 : i32
    %c0_i32_1 = arith.constant 0 : i32
    return %c0_i32, %c0_i32_0 : i32, i32
  }
  func.func @transform_5(%arg0: i32) -> (i32, i32) {
    %c0_i32 = arith.constant 0 : i32
    %c0_i32_0 = arith.constant 0 : i32
    %c0_i32_1 = arith.constant 0 : i32
    return %c0_i32, %c0_i32_0 : i32, i32
  }
  func.func @transform_6(%arg0: i32) -> (i32, i32) {
    %c0_i32 = arith.constant 0 : i32
    %c0_i32_0 = arith.constant 0 : i32
    %c0_i32_1 = arith.constant 0 : i32
    return %c0_i32, %c0_i32_0 : i32, i32
  }
  func.func @transform_7(%arg0: i32) -> (i32, i32) {
    %c0_i32 = arith.constant 0 : i32
    %c0_i32_0 = arith.constant 0 : i32
    return %arg0, %c0_i32 : i32, i32
  }
}

module attributes {stable_mosaic.version = 11 : i64} {
  func.func @qnetwork_kernel(%arg0: i32, %arg1: memref<256x16xf32, #tpu.memory_space<vmem>>, %arg2: memref<16x32xf32, #tpu.memory_space<vmem>>, %arg3: memref<1x32xf32, #tpu.memory_space<vmem>>, %arg4: memref<32x32xf32, #tpu.memory_space<vmem>>, %arg5: memref<1x32xf32, #tpu.memory_space<vmem>>, %arg6: memref<32x128xf32, #tpu.memory_space<vmem>>, %arg7: memref<1x128xf32, #tpu.memory_space<vmem>>, %arg8: memref<256x128xf32, #tpu.memory_space<vmem>>) attributes {dimension_semantics = [#tpu.dimension_semantics<parallel>], iteration_bounds = array<i64: 1>, scalar_prefetch = 0 : i64, scratch_operands = 0 : i64, tpu.core_type = #tpu.core_type<tc>, window_params = [{transform_indices = @transform_0, window_bounds = array<i64: 256, 16>}, {pipeline_mode = #tpu.pipeline_mode<synchronous>, transform_indices = @transform_1, window_bounds = array<i64: 16, 32>}, {pipeline_mode = #tpu.pipeline_mode<synchronous>, transform_indices = @transform_2, window_bounds = array<i64: 1, 32>}, {pipeline_mode = #tpu.pipeline_mode<synchronous>, transform_indices = @transform_3, window_bounds = array<i64: 32, 32>}, {pipeline_mode = #tpu.pipeline_mode<synchronous>, transform_indices = @transform_4, window_bounds = array<i64: 1, 32>}, {pipeline_mode = #tpu.pipeline_mode<synchronous>, transform_indices = @transform_5, window_bounds = array<i64: 32, 128>}, {pipeline_mode = #tpu.pipeline_mode<synchronous>, transform_indices = @transform_6, window_bounds = array<i64: 1, 128>}, {transform_indices = @transform_7, window_bounds = array<i64: 256, 128>}]} {
    %c0 = arith.constant 0 : index
    %c0_0 = arith.constant 0 : index
    %0 = vector.load %arg1[%c0, %c0_0] : memref<256x16xf32, #tpu.memory_space<vmem>>, vector<256x16xf32>
    %c0_1 = arith.constant 0 : index
    %c0_2 = arith.constant 0 : index
    %1 = vector.load %arg2[%c0_1, %c0_2] : memref<16x32xf32, #tpu.memory_space<vmem>>, vector<16x32xf32>
    %cst = arith.constant dense<0.000000e+00> : vector<256x32xf32>
    %2 = tpu.matmul %0, %1, %cst {dimension_numbers = #tpu.dot_dimension_numbers<[1], [0], [0], [1], [0, 0, 1, 1], [], []>} : vector<256x16xf32>, vector<16x32xf32>, vector<256x32xf32> -> vector<256x32xf32>
    %c0_3 = arith.constant 0 : index
    %c0_4 = arith.constant 0 : index
    %3 = vector.load %arg3[%c0_3, %c0_4] : memref<1x32xf32, #tpu.memory_space<vmem>>, vector<1x32xf32>
    %4 = vector.broadcast %3 : vector<1x32xf32> to vector<256x32xf32>
    %5 = arith.addf %2, %4 : vector<256x32xf32>
    %cst_5 = arith.constant 0.000000e+00 : f32
    %6 = vector.broadcast %cst_5 : f32 to vector<256x32xf32>
    %7 = arith.maximumf %5, %6 : vector<256x32xf32>
    %c0_6 = arith.constant 0 : index
    %c0_7 = arith.constant 0 : index
    %8 = vector.load %arg4[%c0_6, %c0_7] : memref<32x32xf32, #tpu.memory_space<vmem>>, vector<32x32xf32>
    %cst_8 = arith.constant dense<0.000000e+00> : vector<256x32xf32>
    %9 = tpu.matmul %7, %8, %cst_8 {dimension_numbers = #tpu.dot_dimension_numbers<[1], [0], [0], [1], [0, 0, 1, 1], [], []>} : vector<256x32xf32>, vector<32x32xf32>, vector<256x32xf32> -> vector<256x32xf32>
    %c0_9 = arith.constant 0 : index
    %c0_10 = arith.constant 0 : index
    %10 = vector.load %arg5[%c0_9, %c0_10] : memref<1x32xf32, #tpu.memory_space<vmem>>, vector<1x32xf32>
    %11 = vector.broadcast %10 : vector<1x32xf32> to vector<256x32xf32>
    %12 = arith.addf %9, %11 : vector<256x32xf32>
    %cst_11 = arith.constant 0.000000e+00 : f32
    %13 = vector.broadcast %cst_11 : f32 to vector<256x32xf32>
    %14 = arith.maximumf %12, %13 : vector<256x32xf32>
    %c0_12 = arith.constant 0 : index
    %c0_13 = arith.constant 0 : index
    %15 = vector.load %arg6[%c0_12, %c0_13] : memref<32x128xf32, #tpu.memory_space<vmem>>, vector<32x128xf32>
    %cst_14 = arith.constant dense<0.000000e+00> : vector<256x128xf32>
    %16 = tpu.matmul %14, %15, %cst_14 {dimension_numbers = #tpu.dot_dimension_numbers<[1], [0], [0], [1], [0, 0, 1, 1], [], []>} : vector<256x32xf32>, vector<32x128xf32>, vector<256x128xf32> -> vector<256x128xf32>
    %c0_15 = arith.constant 0 : index
    %c0_16 = arith.constant 0 : index
    %17 = vector.load %arg7[%c0_15, %c0_16] : memref<1x128xf32, #tpu.memory_space<vmem>>, vector<1x128xf32>
    %18 = vector.broadcast %17 : vector<1x128xf32> to vector<256x128xf32>
    %19 = arith.addf %16, %18 : vector<256x128xf32>
    %c0_17 = arith.constant 0 : index
    %c0_18 = arith.constant 0 : index
    %20 = vector.load %arg8[%c0_17, %c0_18] : memref<256x128xf32, #tpu.memory_space<vmem>>, vector<256x128xf32>
    tpu.vector_store %arg8[%c0_17, %c0_18], %19 {strides = array<i32>} : memref<256x128xf32, #tpu.memory_space<vmem>>, vector<256x128xf32>,
    return
  }
  func.func @transform_0(%arg0: i32) -> (i32, i32) {
    %c0_i32 = arith.constant 0 : i32
    %c0_i32_0 = arith.constant 0 : i32
    return %arg0, %c0_i32 : i32, i32
  }
  func.func @transform_1(%arg0: i32) -> (i32, i32) {
    %c0_i32 = arith.constant 0 : i32
    %c0_i32_0 = arith.constant 0 : i32
    %c0_i32_1 = arith.constant 0 : i32
    return %c0_i32, %c0_i32_0 : i32, i32
  }
  func.func @transform_2(%arg0: i32) -> (i32, i32) {
    %c0_i32 = arith.constant 0 : i32
    %c0_i32_0 = arith.constant 0 : i32
    %c0_i32_1 = arith.constant 0 : i32
    return %c0_i32, %c0_i32_0 : i32, i32
  }
  func.func @transform_3(%arg0: i32) -> (i32, i32) {
    %c0_i32 = arith.constant 0 : i32
    %c0_i32_0 = arith.constant 0 : i32
    %c0_i32_1 = arith.constant 0 : i32
    return %c0_i32, %c0_i32_0 : i32, i32
  }
  func.func @transform_4(%arg0: i32) -> (i32, i32) {
    %c0_i32 = arith.constant 0 : i32
    %c0_i32_0 = arith.constant 0 : i32
    %c0_i32_1 = arith.constant 0 : i32
    return %c0_i32, %c0_i32_0 : i32, i32
  }
  func.func @transform_5(%arg0: i32) -> (i32, i32) {
    %c0_i32 = arith.constant 0 : i32
    %c0_i32_0 = arith.constant 0 : i32
    %c0_i32_1 = arith.constant 0 : i32
    return %c0_i32, %c0_i32_0 : i32, i32
  }
  func.func @transform_6(%arg0: i32) -> (i32, i32) {
    %c0_i32 = arith.constant 0 : i32
    %c0_i32_0 = arith.constant 0 : i32
    %c0_i32_1 = arith.constant 0 : i32
    return %c0_i32, %c0_i32_0 : i32, i32
  }
  func.func @transform_7(%arg0: i32) -> (i32, i32) {
    %c0_i32 = arith.constant 0 : i32
    %c0_i32_0 = arith.constant 0 : i32
    return %arg0, %c0_i32 : i32, i32
  }
}

</mosaic_0001>

<bundles_post_ra>
// kernel: tpu_custom_call.1
= control target key start
LH: loop header
LB: loop body
LE: loop exit
PB: predicated region body
PF: predicated region fallthrough
CT: control target
= control target key end

     0   :  { %vm68_vm0 = vcmask 130048   ;;  %s1953_s0 = inlined_call_operand.vmem [shape: f32[256,16], index: 0, kind: input, shape index: {}]   ;;  %s1954_s1 = inlined_call_operand.vmem [shape: f32[16,32], index: 1, kind: input, shape index: {}]   ;;  %s1955_s2 = inlined_call_operand.vmem [shape: f32[1,32], index: 2, kind: input, shape index: {}]   ;;  %s1956_s3 = inlined_call_operand.vmem [shape: f32[32,32], index: 3, kind: input, shape index: {}]   ;;  %s1957_s4 = inlined_call_operand.vmem [shape: f32[1,32], index: 4, kind: input, shape index: {}]   ;;  %s1958_s5 = inlined_call_operand.vmem [shape: f32[32,128], index: 5, kind: input, shape index: {}]   ;;  %s1959_s6 = inlined_call_operand.vmem [shape: f32[1,128], index: 6, kind: input, shape index: {}]   ;;  %s1960_s7 = inlined_call_operand.hbm [shape: f32[256,128], index: 7, kind: output, shape index: {}]  }
   0x1   :  { %v60_v0 = vld [vmem:[%s1954_s1 + $0x8] sm:$0xff]  ;;  %v59_v1 = vld [vmem:[%s1954_s1] sm:$0xff]  ;;  %v29_v4 = vld [vmem:[%s1953_s0 + $0x10] sm:$0xff] }
   0x2   :  { %v27_v2 = vld [vmem:[%s1953_s0] sm:$0xff]  ;;  %1372 = vmatprep.subr.mxu0 %v60_v0  ;;  %v28_v3 = vld [vmem:[%s1953_s0 + $0x8] sm:$0xff]  ;;  %1536 = vmatprep.subr.mxu1 %v60_v0  ;;  %v30_v5 = vld [vmem:[%s1953_s0 + $0x18] sm:$0xff] }
   0x3   :  { %1376 = vmatprep.mubr.msk.f32.mxu0 %vm68_vm0, %v27_v2  ;;  %1373 = vmatpush3.msra.mxu0 %v60_v0  ;;  %v43_v6 = vld [vmem:[%s1953_s0 + $0x80] sm:$0xff]  ;;  %v44_v7 = vld [vmem:[%s1953_s0 + $0x88] sm:$0xff]  ;;  %v45_v8 = vld [vmem:[%s1953_s0 + $0x90] sm:$0xff] }
   0x4   :  { %1374 = vmatprep.subr.mxu0 %v59_v1  ;;  %1538 = vmatpush3.msra.mxu1 %v60_v0  ;;  %v31_v9 = vld [vmem:[%s1953_s0 + $0x20] sm:$0xff]  ;;  %v46_v10 = vld [vmem:[%s1953_s0 + $0x98] sm:$0xff]  ;;  %v32_v11 = vld [vmem:[%s1953_s0 + $0x28] sm:$0xff] }
   0x5   :  { %1375 = vmatpush3.msra.mxu0 %v59_v1  ;;  %1537 = vmatprep.subr.mxu1 %v59_v1  ;;  %v47_v12 = vld [vmem:[%s1953_s0 + $0xa0] sm:$0xff]  ;;  %v33_v13 = vld [vmem:[%s1953_s0 + $0x30] sm:$0xff]  ;;  %v425_v14 = vld [vmem:[%s1956_s3 + $0x18] sm:$0xff] }
   0x6   :  { %1377 = vmatmul.mubr.msk.f32.vlgmr.msra.gmra.mxu0 %vm68_vm0, %v28_v3  ;;  %1539 = vmatpush3.msra.mxu1 %v59_v1  ;;  %v424_v15 = vld [vmem:[%s1956_s3 + $0x10] sm:$0xff] }
   0x7   :  { %1379 = vmatprep.mubr.msk.f32.mxu0 %vm68_vm0, %v29_v4  ;;  %1400 = vmatprep.mubr.msk.f32.mxu1 %vm68_vm0, %v43_v6 }
   0x8   :  { %1401 = vmatmul.mubr.msk.f32.vlgmr.msra.gmra.mxu1 %vm68_vm0, %v44_v7  ;;  %1424 = vmatprep.subr.mxu1 %v425_v14 }
   0x9   :  { %1403 = vmatprep.mubr.msk.f32.mxu1 %vm68_vm0, %v45_v8 }
   0xa   :  { %1380 = vmatmul.mubr.msk.f32.gmra.mxu0 %vm68_vm0, %v30_v5 }
   0xb   :  { %1382 = vmatprep.mubr.msk.f32.mxu0 %vm68_vm0, %v31_v9 }
   0xc   :  { %1404 = vmatmul.mubr.msk.f32.gmra.mxu1 %vm68_vm0, %v46_v10 }
   0xd   :  { %12 = vsyncpa [#allocation3], 0  ;;  %1406 = vmatprep.mubr.msk.f32.mxu1 %vm68_vm0, %v47_v12  ;;  %v48_v16 = vld [vmem:[%s1953_s0 + $0xa8] sm:$0xff]  ;;  %v34_v17 = vld [vmem:[%s1953_s0 + $0x38] sm:$0xff]  ;;  %1425 = vmatpush3.msra.mxu1 %v425_v14  ;;  %vm433_vm1 = vcmask 261120  }
   0xe   :  { %1383 = vmatmul.mubr.msk.f32.gmra.mxu0 %vm68_vm0, %v32_v11  ;;  %v49_v18 = vld [vmem:[%s1953_s0 + $0xb0] sm:$0xff]  ;;  %v35_v19 = vld [vmem:[%s1953_s0 + $0x40] sm:$0xff]  ;;  %1426 = vmatprep.subr.mxu1 %v424_v15  ;;  %v423_v20 = vld [vmem:[%s1956_s3 + $0x8] sm:$0xff] }
   0xf   :  { %1385 = vmatprep.mubr.msk.f32.mxu0 %vm68_vm0, %v33_v13  ;;  %v50_v21 = vld [vmem:[%s1953_s0 + $0xb8] sm:$0xff]  ;;  %v36_v22 = vld [vmem:[%s1953_s0 + $0x48] sm:$0xff]  ;;  %v51_v23 = vld [vmem:[%s1953_s0 + $0xc0] sm:$0xff]  ;;  %1427 = vmatpush3.msra.mxu1 %v424_v15 }
  0x10   :  { %1407 = vmatmul.mubr.msk.f32.gmra.mxu1 %vm68_vm0, %v48_v16  ;;  %v37_v24 = vld [vmem:[%s1953_s0 + $0x50] sm:$0xff]  ;;  %1428 = vmatprep.subr.mxu1 %v423_v20  ;;  %v422_v25 = vld [vmem:[%s1956_s3] sm:$0xff]  ;;  %v52_v26 = vld [vmem:[%s1953_s0 + $0xc8] sm:$0xff] }
  0x11   :  { %1409 = vmatprep.mubr.msk.f32.mxu1 %vm68_vm0, %v49_v18  ;;  %v38_v27 = vld [vmem:[%s1953_s0 + $0x58] sm:$0xff]  ;;  %v53_v28 = vld [vmem:[%s1953_s0 + $0xd0] sm:$0xff]  ;;  %1429 = vmatpush3.msra.mxu1 %v423_v20  ;;  %v39_v29 = vld [vmem:[%s1953_s0 + $0x60] sm:$0xff] }
  0x12   :  { %1386 = vmatmul.mubr.msk.f32.gmra.mxu0 %vm68_vm0, %v34_v17  ;;  %1430 = vmatprep.subr.mxu1 %v422_v25  ;;  %v54_v30 = vld [vmem:[%s1953_s0 + $0xd8] sm:$0xff]  ;;  %v40_v31 = vld [vmem:[%s1953_s0 + $0x68] sm:$0xff]  ;;  %v55_v32 = vld [vmem:[%s1953_s0 + $0xe0] sm:$0xff] }
  0x13   :  { %1388 = vmatprep.mubr.msk.f32.mxu0 %vm68_vm0, %v35_v19  ;;  %1431 = vmatpush3.msra.mxu1 %v422_v25  ;;  %v41_v33 = vld [vmem:[%s1953_s0 + $0x70] sm:$0xff]  ;;  %v56_v34 = vld [vmem:[%s1953_s0 + $0xe8] sm:$0xff]  ;;  %v42_v35 = vld [vmem:[%s1953_s0 + $0x78] sm:$0xff] }
  0x14   :  { %1410 = vmatmul.mubr.msk.f32.gmra.mxu1 %vm68_vm0, %v50_v21  ;;  %v57_v36 = vld [vmem:[%s1953_s0 + $0xf0] sm:$0xff]  ;;  %v58_v37 = vld [vmem:[%s1953_s0 + $0xf8] sm:$0xff]  ;;  %v788_v40 = vld [vmem:[%s1958_s5 + $0x8] sm:$0xff] }
  0x15   :  { %1412 = vmatprep.mubr.msk.f32.mxu1 %vm68_vm0, %v51_v23  ;;  %v790_v38 = vld [vmem:[%s1958_s5 + $0x18] sm:$0xff]  ;;  %v789_v39 = vld [vmem:[%s1958_s5 + $0x10] sm:$0xff]  ;;  %v787_v41 = vld [vmem:[%s1958_s5] sm:$0xff] }
  0x16   :  { %1389 = vmatmul.mubr.msk.f32.gmra.mxu0 %vm68_vm0, %v36_v22  ;;  %1480 = vmatprep.subr.mxu0 %v790_v38  ;;  %v1769_v42 = vld [vmem:[%s1955_s2] ss:$0 sm:$0xff] }
  0x17   :  { %1391 = vmatprep.mubr.msk.f32.mxu0 %vm68_vm0, %v37_v24  ;;  %1481 = vmatpush3.msra.mxu0 %v790_v38 }
  0x18   :  { %1413 = vmatmul.mubr.msk.f32.gmra.mxu1 %vm68_vm0, %v52_v26  ;;  %1482 = vmatprep.subr.mxu0 %v789_v39 }
  0x19   :  { %1415 = vmatprep.mubr.msk.f32.mxu1 %vm68_vm0, %v53_v28  ;;  %1483 = vmatpush3.msra.mxu0 %v789_v39 }
  0x1a   :  { %1392 = vmatmul.mubr.msk.f32.gmra.mxu0 %vm68_vm0, %v38_v27  ;;  %1484 = vmatprep.subr.mxu0 %v788_v40 }
  0x1b   :  { %1394 = vmatprep.mubr.msk.f32.mxu0 %vm68_vm0, %v39_v29  ;;  %1485 = vmatpush3.msra.mxu0 %v788_v40 }
  0x1c   :  { %1416 = vmatmul.mubr.msk.f32.gmra.mxu1 %vm68_vm0, %v54_v30  ;;  %1486 = vmatprep.subr.mxu0 %v787_v41 }
  0x1d   :  { %1418 = vmatprep.mubr.msk.f32.mxu1 %vm68_vm0, %v55_v32  ;;  %1487 = vmatpush3.msra.mxu0 %v787_v41 }
  0x1e   :  { %1395 = vmatmul.mubr.msk.f32.gmra.mxu0 %vm68_vm0, %v40_v31 }
  0x1f   :  { %1397 = vmatprep.mubr.msk.f32.mxu0 %vm68_vm0, %v41_v33 }
  0x20   :  { %1419 = vmatmul.mubr.msk.f32.gmra.mxu1 %vm68_vm0, %v56_v34 }
  0x21   :  { %1421 = vmatprep.mubr.msk.f32.mxu1 %vm68_vm0, %v57_v36 }
  0x22   :  { %1398 = vmatmul.mubr.msk.f32.gmra.mxu0 %vm68_vm0, %v42_v35 }
  0x24   :  { %1422 = vmatmul.mubr.msk.f32.gmra.mxu1 %vm68_vm0, %v58_v37 }
  0xc6   :  { %v1378_v43 = vpop.f32.mrf.mxu0 }
  0xc7   :  { %v237_v44 = vadd.f32 %v1378_v43, %v1769_v42 }
  0xc8   :  { %v231_v45 = vpop.f32.mrf.mxu0  ;;  %v1773_v47 = vpop.f32.mrf.mxu1 }
  0xc9   :  { %v232_v46 = vadd.f32 %v1769_v42, %v231_v45  ;;  %v391_v51 = vmax.f32 %v237_v44, 0.0  ;;  %v317_v40 = vadd.f32 %v1773_v47, %v1769_v42 }
  0xca   :  { %v1381_v48 = vpop.f32.mrf.mxu0  ;;  %v311_v50 = vpop.f32.mrf.mxu1 }
  0xcb   :  { %v390_v49 = vmax.f32 %v232_v46, 0.0  ;;  %v247_v52 = vadd.f32 %v1381_v48, %v1769_v42  ;;  %v312_v30 = vadd.f32 %v1769_v42, %v311_v50  ;;  %v407_v45 = vmax.f32 %v317_v40, 0.0 }
  0xcc   :  { %v241_v53 = vpop.f32.mrf.mxu0  ;;  %v1778_v55 = vpop.f32.mrf.mxu1 }
  0xcd   :  { %v242_v54 = vadd.f32 %v1769_v42, %v241_v53  ;;  %1432 = vmatprep.mubr.msk.f32.mxu1 %vm433_vm1, %v390_v49  ;;  %v393_v59 = vmax.f32 %v247_v52, 0.0  ;;  %v406_v37 = vmax.f32 %v312_v30, 0.0  ;;  %v327_v46 = vadd.f32 %v1778_v55, %v1769_v42 }
  0xce   :  { %v1384_v56 = vpop.f32.mrf.mxu0  ;;  %1433 = vmatmul.mubr.msk.f32.vlgmr.msra.gmra.mxu1 %vm433_vm1, %v391_v51  ;;  %v321_v58 = vpop.f32.mrf.mxu1 }
  0xcf   :  { %v392_v57 = vmax.f32 %v242_v54, 0.0  ;;  %v257_v60 = vadd.f32 %v1384_v56, %v1769_v42  ;;  %v322_v38 = vadd.f32 %v1769_v42, %v321_v58  ;;  %v409_v50 = vmax.f32 %v327_v46, 0.0 }
  0xd0   :  { %v251_v61 = vpop.f32.mrf.mxu0  ;;  %v1784_v63 = vpop.f32.mrf.mxu1 }
  0xd1   :  { %v252_v62 = vadd.f32 %v1769_v42, %v251_v61  ;;  %1435 = vmatprep.mubr.msk.f32.mxu1 %vm433_vm1, %v392_v57  ;;  %v395_v2 = vmax.f32 %v257_v60, 0.0  ;;  %v408_v43 = vmax.f32 %v322_v38, 0.0  ;;  %v337_v51 = vadd.f32 %v1784_v63, %v1769_v42 }
  0xd2   :  { %v1387_v0 = vpop.f32.mrf.mxu0  ;;  %1436 = vmatmul.mubr.msk.f32.gmra.mxu1 %vm433_vm1, %v393_v59  ;;  %v331_v5 = vpop.f32.mrf.mxu1 }
  0xd3   :  { %v394_v1 = vmax.f32 %v252_v62, 0.0  ;;  %v267_v3 = vadd.f32 %v1387_v0, %v1769_v42  ;;  %v332_v44 = vadd.f32 %v1769_v42, %v331_v5  ;;  %v411_v55 = vmax.f32 %v337_v51, 0.0 }
  0xd4   :  { %v261_v4 = vpop.f32.mrf.mxu0  ;;  %v1411_v12 = vpop.f32.mrf.mxu1 }
  0xd5   :  { %v262_v6 = vadd.f32 %v1769_v42, %v261_v4  ;;  %1438 = vmatprep.mubr.msk.f32.mxu1 %vm433_vm1, %v394_v1  ;;  %v397_v9 = vmax.f32 %v267_v3, 0.0  ;;  %v410_v49 = vmax.f32 %v332_v44, 0.0  ;;  %v347_v56 = vadd.f32 %v1411_v12, %v1769_v42  ;;  %v1847_v12 = vld [vmem:[%s1957_s4] ss:$0 sm:$0xff] }
  0xd6   :  { %v1390_v7 = vpop.f32.mrf.mxu0  ;;  %1439 = vmatmul.mubr.msk.f32.gmra.mxu1 %vm433_vm1, %v395_v2  ;;  %v341_v19 = vpop.f32.mrf.mxu1 }
  0xd7   :  { %v396_v8 = vmax.f32 %v262_v6, 0.0  ;;  %v277_v10 = vadd.f32 %v1390_v7, %v1769_v42  ;;  %v342_v47 = vadd.f32 %v1769_v42, %v341_v19  ;;  %v413_v60 = vmax.f32 %v347_v56, 0.0 }
  0xd8   :  { %v271_v11 = vpop.f32.mrf.mxu0  ;;  %v1414_v26 = vpop.f32.mrf.mxu1 }
  0xd9   :  { %v272_v13 = vadd.f32 %v1769_v42, %v271_v11  ;;  %1441 = vmatprep.mubr.msk.f32.mxu1 %vm433_vm1, %v396_v8  ;;  %v399_v16 = vmax.f32 %v277_v10, 0.0  ;;  %v412_v53 = vmax.f32 %v342_v47, 0.0  ;;  %v357_v61 = vadd.f32 %v1414_v26, %v1769_v42 }
  0xda   :  { %v1393_v14 = vpop.f32.mrf.mxu0  ;;  %1442 = vmatmul.mubr.msk.f32.gmra.mxu1 %vm433_vm1, %v397_v9  ;;  %v351_v34 = vpop.f32.mrf.mxu1 }
  0xdb   :  { %v398_v15 = vmax.f32 %v272_v13, 0.0  ;;  %v287_v17 = vadd.f32 %v1393_v14, %v1769_v42  ;;  %v352_v54 = vadd.f32 %v1769_v42, %v351_v34  ;;  %v415_v1 = vmax.f32 %v357_v61, 0.0 }
  0xdc   :  { %v281_v18 = vpop.f32.mrf.mxu0  ;;  %v1417_v41 = vpop.f32.mrf.mxu1 }
  0xdd   :  { %v282_v20 = vadd.f32 %v1769_v42, %v281_v18  ;;  %1444 = vmatprep.mubr.msk.f32.mxu1 %vm433_vm1, %v398_v15  ;;  %v401_v23 = vmax.f32 %v287_v17, 0.0  ;;  %v414_v58 = vmax.f32 %v352_v54, 0.0  ;;  %v367_v2 = vadd.f32 %v1417_v41, %v1769_v42 }
  0xde   :  { %v1396_v21 = vpop.f32.mrf.mxu0  ;;  %1445 = vmatmul.mubr.msk.f32.gmra.mxu1 %vm433_vm1, %v399_v16  ;;  %v361_v48 = vpop.f32.mrf.mxu1 }
  0xdf   :  { %v400_v22 = vmax.f32 %v282_v20, 0.0  ;;  %v297_v24 = vadd.f32 %v1396_v21, %v1769_v42  ;;  %v362_v59 = vadd.f32 %v1769_v42, %v361_v48  ;;  %v417_v6 = vmax.f32 %v367_v2, 0.0 }
  0xe0   :  { %v291_v25 = vpop.f32.mrf.mxu0  ;;  %v1420_v52 = vpop.f32.mrf.mxu1 }
  0xe1   :  { %v292_v27 = vadd.f32 %v1769_v42, %v291_v25  ;;  %1447 = vmatprep.mubr.msk.f32.mxu1 %vm433_vm1, %v400_v22  ;;  %v403_v31 = vmax.f32 %v297_v24, 0.0  ;;  %v416_v63 = vmax.f32 %v362_v59, 0.0  ;;  %v377_v7 = vadd.f32 %v1420_v52, %v1769_v42 }
  0xe2   :  { %v1399_v28 = vpop.f32.mrf.mxu0  ;;  %1448 = vmatmul.mubr.msk.f32.gmra.mxu1 %vm433_vm1, %v401_v23  ;;  %v371_v57 = vpop.f32.mrf.mxu1 }
  0xe3   :  { %v402_v29 = vmax.f32 %v292_v27, 0.0  ;;  %v307_v32 = vadd.f32 %v1399_v28, %v1769_v42  ;;  %v372_v0 = vadd.f32 %v1769_v42, %v371_v57  ;;  %v419_v9 = vmax.f32 %v377_v7, 0.0 }
  0xe4   :  { %v301_v33 = vpop.f32.mrf.mxu0  ;;  %v1423_v62 = vpop.f32.mrf.mxu1 }
  0xe5   :  { %v302_v35 = vadd.f32 %v1769_v42, %v301_v33  ;;  %1450 = vmatprep.mubr.msk.f32.mxu1 %vm433_vm1, %v402_v29  ;;  %v405_v39 = vmax.f32 %v307_v32, 0.0  ;;  %v418_v4 = vmax.f32 %v372_v0, 0.0  ;;  %v387_v10 = vadd.f32 %v1423_v62, %v1769_v42 }
  0xe6   :  { %1451 = vmatmul.mubr.msk.f32.gmra.mxu1 %vm433_vm1, %v403_v31  ;;  %v381_v3 = vpop.f32.mrf.mxu1 }
  0xe7   :  { %v404_v36 = vmax.f32 %v302_v35, 0.0  ;;  %v382_v5 = vadd.f32 %v1769_v42, %v381_v3  ;;  %v421_v11 = vmax.f32 %v387_v10, 0.0 }
  0xe9   :  { %1453 = vmatprep.mubr.msk.f32.mxu1 %vm433_vm1, %v404_v36  ;;  %v420_v8 = vmax.f32 %v382_v5, 0.0 }
  0xea   :  { %1454 = vmatmul.mubr.msk.f32.gmra.mxu1 %vm433_vm1, %v405_v39 }
  0xeb   :  { %1456 = vmatprep.mubr.msk.f32.mxu1 %vm433_vm1, %v406_v37 }
  0xee   :  { %1457 = vmatmul.mubr.msk.f32.gmra.mxu1 %vm433_vm1, %v407_v45 }
  0xef   :  { %1459 = vmatprep.mubr.msk.f32.mxu1 %vm433_vm1, %v408_v43 }
  0xf2   :  { %1460 = vmatmul.mubr.msk.f32.gmra.mxu1 %vm433_vm1, %v409_v50 }
  0xf3   :  { %1462 = vmatprep.mubr.msk.f32.mxu1 %vm433_vm1, %v410_v49 }
  0xf6   :  { %1463 = vmatmul.mubr.msk.f32.gmra.mxu1 %vm433_vm1, %v411_v55 }
  0xf7   :  { %1465 = vmatprep.mubr.msk.f32.mxu1 %vm433_vm1, %v412_v53 }
  0xfa   :  { %1466 = vmatmul.mubr.msk.f32.gmra.mxu1 %vm433_vm1, %v413_v60 }
  0xfb   :  { %1468 = vmatprep.mubr.msk.f32.mxu1 %vm433_vm1, %v414_v58 }
  0xfe   :  { %1469 = vmatmul.mubr.msk.f32.gmra.mxu1 %vm433_vm1, %v415_v1 }
  0xff   :  { %1471 = vmatprep.mubr.msk.f32.mxu1 %vm433_vm1, %v416_v63 }
 0x102   :  { %1472 = vmatmul.mubr.msk.f32.gmra.mxu1 %vm433_vm1, %v417_v6 }
 0x103   :  { %1474 = vmatprep.mubr.msk.f32.mxu1 %vm433_vm1, %v418_v4 }
 0x106   :  { %1475 = vmatmul.mubr.msk.f32.gmra.mxu1 %vm433_vm1, %v419_v9 }
 0x107   :  { %1477 = vmatprep.mubr.msk.f32.mxu1 %vm433_vm1, %v420_v8 }
 0x10a   :  { %1478 = vmatmul.mubr.msk.f32.gmra.mxu1 %vm433_vm1, %v421_v11 }
 0x18e   :  { %v1434_v13 = vpop.f32.mrf.mxu1 }
 0x18f   :  { %v602_v14 = vadd.f32 %v1434_v13, %v1847_v12 }
 0x190   :  { %v596_v15 = vpop.f32.mrf.mxu1 }
 0x191   :  { %v597_v16 = vadd.f32 %v1847_v12, %v596_v15  ;;  %v756_v18 = vmax.f32 %v602_v14, 0.0 }
 0x192   :  { %v1437_v17 = vpop.f32.mrf.mxu1 }
 0x193   :  { %v755_v42 = vmax.f32 %v597_v16, 0.0  ;;  %v612_v19 = vadd.f32 %v1437_v17, %v1847_v12 }
 0x194   :  { %v606_v20 = vpop.f32.mrf.mxu1 }
 0x195   :  { %v607_v21 = vadd.f32 %v1847_v12, %v606_v20  ;;  %1488 = vmatprep.mubr.msk.f32.mxu0 %vm433_vm1, %v755_v42  ;;  %v758_v24 = vmax.f32 %v612_v19, 0.0 }
 0x196   :  { %v1440_v22 = vpop.f32.mrf.mxu1  ;;  %1489 = vmatmul.mubr.msk.f32.vlgmr.msra.gmra.mxu0 %vm433_vm1, %v756_v18 }
 0x197   :  { %v757_v23 = vmax.f32 %v607_v21, 0.0  ;;  %v622_v25 = vadd.f32 %v1440_v22, %v1847_v12 }
 0x198   :  { %v616_v26 = vpop.f32.mrf.mxu1 }
 0x199   :  { %v617_v27 = vadd.f32 %v1847_v12, %v616_v26  ;;  %1491 = vmatprep.mubr.msk.f32.mxu0 %vm433_vm1, %v757_v23  ;;  %v760_v30 = vmax.f32 %v622_v25, 0.0 }
 0x19a   :  { %v1443_v28 = vpop.f32.mrf.mxu1  ;;  %1492 = vmatmul.mubr.msk.f32.gmra.mxu0 %vm433_vm1, %v758_v24 }
 0x19b   :  { %v759_v29 = vmax.f32 %v617_v27, 0.0  ;;  %v632_v31 = vadd.f32 %v1443_v28, %v1847_v12 }
 0x19c   :  { %v626_v32 = vpop.f32.mrf.mxu1 }
 0x19d   :  { %v627_v33 = vadd.f32 %v1847_v12, %v626_v32  ;;  %1494 = vmatprep.mubr.msk.f32.mxu0 %vm433_vm1, %v759_v29  ;;  %v762_v36 = vmax.f32 %v632_v31, 0.0 }
 0x19e   :  { %v1446_v34 = vpop.f32.mrf.mxu1  ;;  %1495 = vmatmul.mubr.msk.f32.gmra.mxu0 %vm433_vm1, %v760_v30 }
 0x19f   :  { %v761_v35 = vmax.f32 %v627_v33, 0.0  ;;  %v642_v37 = vadd.f32 %v1446_v34, %v1847_v12 }
 0x1a0   :  { %v636_v38 = vpop.f32.mrf.mxu1 }
 0x1a1   :  { %v637_v39 = vadd.f32 %v1847_v12, %v636_v38  ;;  %1497 = vmatprep.mubr.msk.f32.mxu0 %vm433_vm1, %v761_v35  ;;  %v764_v43 = vmax.f32 %v642_v37, 0.0 }
 0x1a2   :  { %v1449_v40 = vpop.f32.mrf.mxu1  ;;  %1498 = vmatmul.mubr.msk.f32.gmra.mxu0 %vm433_vm1, %v762_v36 }
 0x1a3   :  { %v763_v41 = vmax.f32 %v637_v39, 0.0  ;;  %v652_v44 = vadd.f32 %v1449_v40, %v1847_v12 }
 0x1a4   :  { %v646_v45 = vpop.f32.mrf.mxu1 }
 0x1a5   :  { %v647_v46 = vadd.f32 %v1847_v12, %v646_v45  ;;  %1500 = vmatprep.mubr.msk.f32.mxu0 %vm433_vm1, %v763_v41  ;;  %v766_v47 = vmax.f32 %v652_v44, 0.0 }
 0x1a6   :  { %v1452_v48 = vpop.f32.mrf.mxu1  ;;  %1501 = vmatmul.mubr.msk.f32.gmra.mxu0 %vm433_vm1, %v764_v43 }
 0x1a7   :  { %v765_v49 = vmax.f32 %v647_v46, 0.0  ;;  %v662_v50 = vadd.f32 %v1452_v48, %v1847_v12  ;;  %v1916_v46 = vld [vmem:[%s1959_s6] ss:$0 sm:$0xff]  ;;  %s1565_s6 = smov [#allocation2]  }
 0x1a8   :  { %v656_v51 = vpop.f32.mrf.mxu1  ;;  %s1156_s12 = sshll.u32 %s1565_s6, 4  ;;  %s1157_s12 = int_to_ptr.vmem [resolvable:$true] %s1156_s12 }
 0x1a9   :  { %v657_v52 = vadd.f32 %v1847_v12, %v656_v51  ;;  %1503 = vmatprep.mubr.msk.f32.mxu0 %vm433_vm1, %v765_v49  ;;  %v768_v55 = vmax.f32 %v662_v50, 0.0  ;;  %s1543_s13 = scalar_lea.vmem %s1157_s12, 4096  ;;  %p1548_p1 = scmp.lt.s32.totalorder %s1157_s12, %s1157_s12 }
 0x1aa   :  { %v1455_v53 = vpop.f32.mrf.mxu1  ;;  %1504 = vmatmul.mubr.msk.f32.gmra.mxu0 %vm433_vm1, %v766_v47  ;;  %p1544_p0 = scmp.ne.s32.totalorder %s1157_s12, %s1543_s13  ;;  %p1549_p2 = scmp.lt.s32.totalorder %s1543_s13, %s1543_s13 }
 0x1ab   :  { %v767_v54 = vmax.f32 %v657_v52, 0.0  ;;  %v672_v56 = vadd.f32 %v1455_v53, %v1847_v12 }
 0x1ac   :  { %v666_v57 = vpop.f32.mrf.mxu1  ;;  %p1550_p3 = por %p1549_p2, %p1548_p1 }
 0x1ad   :  { %v667_v58 = vadd.f32 %v1847_v12, %v666_v57  ;;  %1506 = vmatprep.mubr.msk.f32.mxu0 %vm433_vm1, %v767_v54  ;;  %v770_v61 = vmax.f32 %v672_v56, 0.0 }
 0x1ae   :  { %v1458_v59 = vpop.f32.mrf.mxu1  ;;  %1507 = vmatmul.mubr.msk.f32.gmra.mxu0 %vm433_vm1, %v768_v55  ;;  %p1551_p4 = pnand %p1550_p3, %p1544_p0 }
 0x1af   :  { %v769_v60 = vmax.f32 %v667_v58, 0.0  ;;  %v682_v62 = vadd.f32 %v1458_v59, %v1847_v12 }
 0x1b0   :  { %v676_v63 = vpop.f32.mrf.mxu1 }
 0x1b1   :  { %v677_v0 = vadd.f32 %v1847_v12, %v676_v63  ;;  %1509 = vmatprep.mubr.msk.f32.mxu0 %vm433_vm1, %v769_v60  ;;  %v772_v3 = vmax.f32 %v682_v62, 0.0 }
 0x1b2   :  { %v1461_v1 = vpop.f32.mrf.mxu1  ;;  %1510 = vmatmul.mubr.msk.f32.gmra.mxu0 %vm433_vm1, %v770_v61 }
 0x1b3   :  { %v771_v2 = vmax.f32 %v677_v0, 0.0  ;;  %v692_v4 = vadd.f32 %v1461_v1, %v1847_v12 }
 0x1b4   :  { %v686_v5 = vpop.f32.mrf.mxu1 }
 0x1b5   :  { %v687_v6 = vadd.f32 %v1847_v12, %v686_v5  ;;  %1512 = vmatprep.mubr.msk.f32.mxu0 %vm433_vm1, %v771_v2  ;;  %v774_v9 = vmax.f32 %v692_v4, 0.0 }
 0x1b6   :  { %v1464_v7 = vpop.f32.mrf.mxu1  ;;  %1513 = vmatmul.mubr.msk.f32.gmra.mxu0 %vm433_vm1, %v772_v3 }
 0x1b7   :  { %v773_v8 = vmax.f32 %v687_v6, 0.0  ;;  %v702_v10 = vadd.f32 %v1464_v7, %v1847_v12 }
 0x1b8   :  { %v696_v11 = vpop.f32.mrf.mxu1 }
 0x1b9   :  { %v697_v13 = vadd.f32 %v1847_v12, %v696_v11  ;;  %1515 = vmatprep.mubr.msk.f32.mxu0 %vm433_vm1, %v773_v8  ;;  %v776_v16 = vmax.f32 %v702_v10, 0.0 }
 0x1ba   :  { %v1467_v14 = vpop.f32.mrf.mxu1  ;;  %1516 = vmatmul.mubr.msk.f32.gmra.mxu0 %vm433_vm1, %v774_v9 }
 0x1bb   :  { %v775_v15 = vmax.f32 %v697_v13, 0.0  ;;  %v712_v17 = vadd.f32 %v1467_v14, %v1847_v12 }
 0x1bc   :  { %v706_v42 = vpop.f32.mrf.mxu1 }
 0x1bd   :  { %v707_v18 = vadd.f32 %v1847_v12, %v706_v42  ;;  %1518 = vmatprep.mubr.msk.f32.mxu0 %vm433_vm1, %v775_v15  ;;  %v778_v21 = vmax.f32 %v712_v17, 0.0 }
 0x1be   :  { %v1470_v19 = vpop.f32.mrf.mxu1  ;;  %1519 = vmatmul.mubr.msk.f32.gmra.mxu0 %vm433_vm1, %v776_v16 }
 0x1bf   :  { %v777_v20 = vmax.f32 %v707_v18, 0.0  ;;  %v722_v22 = vadd.f32 %v1470_v19, %v1847_v12 }
 0x1c0   :  { %v716_v23 = vpop.f32.mrf.mxu1 }
 0x1c1   :  { %v717_v24 = vadd.f32 %v1847_v12, %v716_v23  ;;  %1521 = vmatprep.mubr.msk.f32.mxu0 %vm433_vm1, %v777_v20  ;;  %v780_v27 = vmax.f32 %v722_v22, 0.0 }
 0x1c2   :  { %v1473_v25 = vpop.f32.mrf.mxu1  ;;  %1522 = vmatmul.mubr.msk.f32.gmra.mxu0 %vm433_vm1, %v778_v21 }
 0x1c3   :  { %v779_v26 = vmax.f32 %v717_v24, 0.0  ;;  %v732_v28 = vadd.f32 %v1473_v25, %v1847_v12 }
 0x1c4   :  { %v726_v29 = vpop.f32.mrf.mxu1 }
 0x1c5   :  { %v727_v30 = vadd.f32 %v1847_v12, %v726_v29  ;;  %1524 = vmatprep.mubr.msk.f32.mxu0 %vm433_vm1, %v779_v26  ;;  %v782_v33 = vmax.f32 %v732_v28, 0.0 }
 0x1c6   :  { %v1476_v31 = vpop.f32.mrf.mxu1  ;;  %1525 = vmatmul.mubr.msk.f32.gmra.mxu0 %vm433_vm1, %v780_v27 }
 0x1c7   :  { %v781_v32 = vmax.f32 %v727_v30, 0.0  ;;  %v742_v34 = vadd.f32 %v1476_v31, %v1847_v12 }
 0x1c8   :  { %v736_v35 = vpop.f32.mrf.mxu1 }
 0x1c9   :  { %v737_v36 = vadd.f32 %v1847_v12, %v736_v35  ;;  %1527 = vmatprep.mubr.msk.f32.mxu0 %vm433_vm1, %v781_v32  ;;  %v784_v39 = vmax.f32 %v742_v34, 0.0 }
 0x1ca   :  { %v1479_v37 = vpop.f32.mrf.mxu1  ;;  %1528 = vmatmul.mubr.msk.f32.gmra.mxu0 %vm433_vm1, %v782_v33 }
 0x1cb   :  { %v783_v38 = vmax.f32 %v737_v36, 0.0  ;;  %v752_v40 = vadd.f32 %v1479_v37, %v1847_v12 }
 0x1cc   :  { %v746_v41 = vpop.f32.mrf.mxu1 }
 0x1cd   :  { %v747_v43 = vadd.f32 %v1847_v12, %v746_v41  ;;  %1530 = vmatprep.mubr.msk.f32.mxu0 %vm433_vm1, %v783_v38  ;;  %v786_v45 = vmax.f32 %v752_v40, 0.0 }
 0x1ce   :  { %1531 = vmatmul.mubr.msk.f32.gmra.mxu0 %vm433_vm1, %v784_v39 }
 0x1cf   :  { %v785_v44 = vmax.f32 %v747_v43, 0.0 }
 0x1d1   :  { %1533 = vmatprep.mubr.msk.f32.mxu0 %vm433_vm1, %v785_v44 }
 0x1d2   :  { %1534 = vmatmul.mubr.msk.f32.gmra.mxu0 %vm433_vm1, %v786_v45 }
 0x256   :  { %v1490_v48 = vpop.f32.mrf.mxu0 }
 0x257   :  { %v966_v49 = vadd.f32 %v1490_v48, %v1916_v46 }
 0x258   :  { %v960_v47 = vpop.f32.mrf.mxu0 }
 0x259   :  { %1120 = vst [vmem:[#allocation2 + $0x8] sm:$0xff] %v966_v49  ;;  %v961_v12 = vadd.f32 %v1916_v46, %v960_v47 }
 0x25a   :  { %v1493_v50 = vpop.f32.mrf.mxu0 }
 0x25b   :  { %1119 = vst [vmem:[#allocation2] sm:$0xff] %v961_v12  ;;  %v976_v51 = vadd.f32 %v1493_v50, %v1916_v46 }
 0x25c   :  { %v970_v52 = vpop.f32.mrf.mxu0 }
 0x25d   :  { %1122 = vst [vmem:[#allocation2 + $0x18] sm:$0xff] %v976_v51  ;;  %v971_v53 = vadd.f32 %v1916_v46, %v970_v52 }
 0x25e   :  { %v1496_v54 = vpop.f32.mrf.mxu0 }
 0x25f   :  { %1121 = vst [vmem:[#allocation2 + $0x10] sm:$0xff] %v971_v53  ;;  %v986_v55 = vadd.f32 %v1496_v54, %v1916_v46 }
 0x260   :  { %v980_v56 = vpop.f32.mrf.mxu0 }
 0x261   :  { %1124 = vst [vmem:[#allocation2 + $0x28] sm:$0xff] %v986_v55  ;;  %v981_v57 = vadd.f32 %v1916_v46, %v980_v56 }
 0x262   :  { %v1499_v58 = vpop.f32.mrf.mxu0 }
 0x263   :  { %1123 = vst [vmem:[#allocation2 + $0x20] sm:$0xff] %v981_v57  ;;  %v996_v59 = vadd.f32 %v1499_v58, %v1916_v46 }
 0x264   :  { %v990_v60 = vpop.f32.mrf.mxu0 }
 0x265   :  { %1126 = vst [vmem:[#allocation2 + $0x38] sm:$0xff] %v996_v59  ;;  %v991_v61 = vadd.f32 %v1916_v46, %v990_v60 }
 0x266   :  { %v1502_v62 = vpop.f32.mrf.mxu0 }
 0x267   :  { %1125 = vst [vmem:[#allocation2 + $0x30] sm:$0xff] %v991_v61  ;;  %v1006_v63 = vadd.f32 %v1502_v62, %v1916_v46 }
 0x268   :  { %v1000_v0 = vpop.f32.mrf.mxu0 }
 0x269   :  { %1128 = vst [vmem:[#allocation2 + $0x48] sm:$0xff] %v1006_v63  ;;  %v1001_v1 = vadd.f32 %v1916_v46, %v1000_v0 }
 0x26a   :  { %v1505_v2 = vpop.f32.mrf.mxu0 }
 0x26b   :  { %1127 = vst [vmem:[#allocation2 + $0x40] sm:$0xff] %v1001_v1  ;;  %v1016_v3 = vadd.f32 %v1505_v2, %v1916_v46 }
 0x26c   :  { %v1010_v4 = vpop.f32.mrf.mxu0 }
 0x26d   :  { %1130 = vst [vmem:[#allocation2 + $0x58] sm:$0xff] %v1016_v3  ;;  %v1011_v5 = vadd.f32 %v1916_v46, %v1010_v4 }
 0x26e   :  { %v1508_v6 = vpop.f32.mrf.mxu0 }
 0x26f   :  { %1129 = vst [vmem:[#allocation2 + $0x50] sm:$0xff] %v1011_v5  ;;  %v1026_v7 = vadd.f32 %v1508_v6, %v1916_v46 }
 0x270   :  { %v1020_v8 = vpop.f32.mrf.mxu0 }
 0x271   :  { %1132 = vst [vmem:[#allocation2 + $0x68] sm:$0xff] %v1026_v7  ;;  %v1021_v9 = vadd.f32 %v1916_v46, %v1020_v8 }
 0x272   :  { %v1511_v10 = vpop.f32.mrf.mxu0 }
 0x273   :  { %1131 = vst [vmem:[#allocation2 + $0x60] sm:$0xff] %v1021_v9  ;;  %v1036_v11 = vadd.f32 %v1511_v10, %v1916_v46 }
 0x274   :  { %v1030_v13 = vpop.f32.mrf.mxu0 }
 0x275   :  { %1134 = vst [vmem:[#allocation2 + $0x78] sm:$0xff] %v1036_v11  ;;  %v1031_v14 = vadd.f32 %v1916_v46, %v1030_v13 }
 0x276   :  { %v1514_v15 = vpop.f32.mrf.mxu0 }
 0x277   :  { %1133 = vst [vmem:[#allocation2 + $0x70] sm:$0xff] %v1031_v14  ;;  %v1046_v16 = vadd.f32 %v1514_v15, %v1916_v46 }
 0x278   :  { %v1040_v17 = vpop.f32.mrf.mxu0 }
 0x279   :  { %1136 = vst [vmem:[#allocation2 + $0x88] sm:$0xff] %v1046_v16  ;;  %v1041_v42 = vadd.f32 %v1916_v46, %v1040_v17 }
 0x27a   :  { %v1517_v18 = vpop.f32.mrf.mxu0 }
 0x27b   :  { %1135 = vst [vmem:[#allocation2 + $0x80] sm:$0xff] %v1041_v42  ;;  %v1056_v19 = vadd.f32 %v1517_v18, %v1916_v46 }
 0x27c   :  { %v1050_v20 = vpop.f32.mrf.mxu0 }
 0x27d   :  { %1138 = vst [vmem:[#allocation2 + $0x98] sm:$0xff] %v1056_v19  ;;  %v1051_v21 = vadd.f32 %v1916_v46, %v1050_v20 }
 0x27e   :  { %v1520_v22 = vpop.f32.mrf.mxu0 }
 0x27f   :  { %1137 = vst [vmem:[#allocation2 + $0x90] sm:$0xff] %v1051_v21  ;;  %v1066_v23 = vadd.f32 %v1520_v22, %v1916_v46 }
 0x280   :  { %v1060_v24 = vpop.f32.mrf.mxu0 }
 0x281   :  { %1140 = vst [vmem:[#allocation2 + $0xa8] sm:$0xff] %v1066_v23  ;;  %v1061_v25 = vadd.f32 %v1916_v46, %v1060_v24 }
 0x282   :  { %v1523_v26 = vpop.f32.mrf.mxu0 }
 0x283   :  { %1139 = vst [vmem:[#allocation2 + $0xa0] sm:$0xff] %v1061_v25  ;;  %v1076_v27 = vadd.f32 %v1523_v26, %v1916_v46 }
 0x284   :  { %v1070_v28 = vpop.f32.mrf.mxu0 }
 0x285   :  { %1142 = vst [vmem:[#allocation2 + $0xb8] sm:$0xff] %v1076_v27  ;;  %v1071_v29 = vadd.f32 %v1916_v46, %v1070_v28 }
 0x286   :  { %v1526_v30 = vpop.f32.mrf.mxu0 }
 0x287   :  { %1141 = vst [vmem:[#allocation2 + $0xb0] sm:$0xff] %v1071_v29  ;;  %v1086_v31 = vadd.f32 %v1526_v30, %v1916_v46 }
 0x288   :  { %v1080_v32 = vpop.f32.mrf.mxu0 }
 0x289   :  { %1144 = vst [vmem:[#allocation2 + $0xc8] sm:$0xff] %v1086_v31  ;;  %v1081_v33 = vadd.f32 %v1916_v46, %v1080_v32 }
 0x28a   :  { %v1529_v34 = vpop.f32.mrf.mxu0 }
 0x28b   :  { %1143 = vst [vmem:[#allocation2 + $0xc0] sm:$0xff] %v1081_v33  ;;  %v1096_v35 = vadd.f32 %v1529_v34, %v1916_v46 }
 0x28c   :  { %v1090_v36 = vpop.f32.mrf.mxu0 }
 0x28d   :  { %1146 = vst [vmem:[#allocation2 + $0xd8] sm:$0xff] %v1096_v35  ;;  %v1091_v37 = vadd.f32 %v1916_v46, %v1090_v36 }
 0x28e   :  { %v1532_v38 = vpop.f32.mrf.mxu0 }
 0x28f   :  { %1145 = vst [vmem:[#allocation2 + $0xd0] sm:$0xff] %v1091_v37  ;;  %v1106_v39 = vadd.f32 %v1532_v38, %v1916_v46 }
 0x290   :  { %v1100_v40 = vpop.f32.mrf.mxu0 }
 0x291   :  { %1148 = vst [vmem:[#allocation2 + $0xe8] sm:$0xff] %v1106_v39  ;;  %v1101_v41 = vadd.f32 %v1916_v46, %v1100_v40 }
 0x292   :  { %v1535_v43 = vpop.f32.mrf.mxu0 }
 0x293   :  { %1147 = vst [vmem:[#allocation2 + $0xe0] sm:$0xff] %v1101_v41  ;;  %v1116_v44 = vadd.f32 %v1535_v43, %v1916_v46 }
 0x294   :  { %v1110_v45 = vpop.f32.mrf.mxu0 }
 0x295   :  { %1150 = vst [vmem:[#allocation2 + $0xf8] sm:$0xff] %v1116_v44  ;;  %v1111_v48 = vadd.f32 %v1916_v46, %v1110_v45 }
 0x297   :  { %1149 = vst [vmem:[#allocation2 + $0xf0] sm:$0xff] %v1111_v48 }
 0x298   :  { %1554 = shalt.err (!%p1551_p4)
}
 0x299   :  { %s1566_s14 = smov 128   ;;  %s1567_s15 = smov 8  }
 0x29a   :  { %1162 = dma.vmem_to_hbm [thread:$0]  %s1157_s12, 4096, %s1960_s7, [#allocation3], %s1566_s14, %s1566_s14, %s1567_s15  }
 0x29b   :  { %1563 = dma.done.wait [#allocation3], 4096  }
 0x29c   :  { %1564 = vsyncadd [#allocation3], 4294963200 }
 0x29d   :  { %1166 = vsyncpa [#allocation3], 1 }

// kernel: tpu_custom_call.1
= control target key start
LH: loop header
LB: loop body
LE: loop exit
PB: predicated region body
PF: predicated region fallthrough
CT: control target
= control target key end

     0   :  { %vm68_vm0 = vcmask 130048   ;;  %s1953_s0 = inlined_call_operand.vmem [shape: f32[256,16], index: 0, kind: input, shape index: {}]   ;;  %s1954_s1 = inlined_call_operand.vmem [shape: f32[16,32], index: 1, kind: input, shape index: {}]   ;;  %s1955_s2 = inlined_call_operand.vmem [shape: f32[1,32], index: 2, kind: input, shape index: {}]   ;;  %s1956_s3 = inlined_call_operand.vmem [shape: f32[32,32], index: 3, kind: input, shape index: {}]   ;;  %s1957_s4 = inlined_call_operand.vmem [shape: f32[1,32], index: 4, kind: input, shape index: {}]   ;;  %s1958_s5 = inlined_call_operand.vmem [shape: f32[32,128], index: 5, kind: input, shape index: {}]   ;;  %s1959_s6 = inlined_call_operand.vmem [shape: f32[1,128], index: 6, kind: input, shape index: {}]   ;;  %s1960_s7 = inlined_call_operand.hbm [shape: f32[256,128], index: 7, kind: output, shape index: {}]  }
   0x1   :  { %v60_v0 = vld [vmem:[%s1954_s1 + $0x8] sm:$0xff]  ;;  %v59_v1 = vld [vmem:[%s1954_s1] sm:$0xff]  ;;  %v29_v4 = vld [vmem:[%s1953_s0 + $0x10] sm:$0xff] }
   0x2   :  { %v27_v2 = vld [vmem:[%s1953_s0] sm:$0xff]  ;;  %1372 = vmatprep.subr.mxu0 %v60_v0  ;;  %v28_v3 = vld [vmem:[%s1953_s0 + $0x8] sm:$0xff]  ;;  %1536 = vmatprep.subr.mxu1 %v60_v0  ;;  %v30_v5 = vld [vmem:[%s1953_s0 + $0x18] sm:$0xff] }
   0x3   :  { %1376 = vmatprep.mubr.msk.f32.mxu0 %vm68_vm0, %v27_v2  ;;  %1373 = vmatpush3.msra.mxu0 %v60_v0  ;;  %v43_v6 = vld [vmem:[%s1953_s0 + $0x80] sm:$0xff]  ;;  %v44_v7 = vld [vmem:[%s1953_s0 + $0x88] sm:$0xff]  ;;  %v45_v8 = vld [vmem:[%s1953_s0 + $0x90] sm:$0xff] }
   0x4   :  { %1374 = vmatprep.subr.mxu0 %v59_v1  ;;  %1538 = vmatpush3.msra.mxu1 %v60_v0  ;;  %v31_v9 = vld [vmem:[%s1953_s0 + $0x20] sm:$0xff]  ;;  %v46_v10 = vld [vmem:[%s1953_s0 + $0x98] sm:$0xff]  ;;  %v32_v11 = vld [vmem:[%s1953_s0 + $0x28] sm:$0xff] }
   0x5   :  { %1375 = vmatpush3.msra.mxu0 %v59_v1  ;;  %1537 = vmatprep.subr.mxu1 %v59_v1  ;;  %v47_v12 = vld [vmem:[%s1953_s0 + $0xa0] sm:$0xff]  ;;  %v33_v13 = vld [vmem:[%s1953_s0 + $0x30] sm:$0xff]  ;;  %v425_v14 = vld [vmem:[%s1956_s3 + $0x18] sm:$0xff] }
   0x6   :  { %1377 = vmatmul.mubr.msk.f32.vlgmr.msra.gmra.mxu0 %vm68_vm0, %v28_v3  ;;  %1539 = vmatpush3.msra.mxu1 %v59_v1  ;;  %v424_v15 = vld [vmem:[%s1956_s3 + $0x10] sm:$0xff] }
   0x7   :  { %1379 = vmatprep.mubr.msk.f32.mxu0 %vm68_vm0, %v29_v4  ;;  %1400 = vmatprep.mubr.msk.f32.mxu1 %vm68_vm0, %v43_v6 }
   0x8   :  { %1401 = vmatmul.mubr.msk.f32.vlgmr.msra.gmra.mxu1 %vm68_vm0, %v44_v7  ;;  %1424 = vmatprep.subr.mxu1 %v425_v14 }
   0x9   :  { %1403 = vmatprep.mubr.msk.f32.mxu1 %vm68_vm0, %v45_v8 }
   0xa   :  { %1380 = vmatmul.mubr.msk.f32.gmra.mxu0 %vm68_vm0, %v30_v5 }
   0xb   :  { %1382 = vmatprep.mubr.msk.f32.mxu0 %vm68_vm0, %v31_v9 }
   0xc   :  { %1404 = vmatmul.mubr.msk.f32.gmra.mxu1 %vm68_vm0, %v46_v10 }
   0xd   :  { %12 = vsyncpa [#allocation3], 0  ;;  %1406 = vmatprep.mubr.msk.f32.mxu1 %vm68_vm0, %v47_v12  ;;  %v48_v16 = vld [vmem:[%s1953_s0 + $0xa8] sm:$0xff]  ;;  %v34_v17 = vld [vmem:[%s1953_s0 + $0x38] sm:$0xff]  ;;  %1425 = vmatpush3.msra.mxu1 %v425_v14  ;;  %vm433_vm1 = vcmask 261120  }
   0xe   :  { %1383 = vmatmul.mubr.msk.f32.gmra.mxu0 %vm68_vm0, %v32_v11  ;;  %v49_v18 = vld [vmem:[%s1953_s0 + $0xb0] sm:$0xff]  ;;  %v35_v19 = vld [vmem:[%s1953_s0 + $0x40] sm:$0xff]  ;;  %1426 = vmatprep.subr.mxu1 %v424_v15  ;;  %v423_v20 = vld [vmem:[%s1956_s3 + $0x8] sm:$0xff] }
   0xf   :  { %1385 = vmatprep.mubr.msk.f32.mxu0 %vm68_vm0, %v33_v13  ;;  %v50_v21 = vld [vmem:[%s1953_s0 + $0xb8] sm:$0xff]  ;;  %v36_v22 = vld [vmem:[%s1953_s0 + $0x48] sm:$0xff]  ;;  %v51_v23 = vld [vmem:[%s1953_s0 + $0xc0] sm:$0xff]  ;;  %1427 = vmatpush3.msra.mxu1 %v424_v15 }
  0x10   :  { %1407 = vmatmul.mubr.msk.f32.gmra.mxu1 %vm68_vm0, %v48_v16  ;;  %v37_v24 = vld [vmem:[%s1953_s0 + $0x50] sm:$0xff]  ;;  %1428 = vmatprep.subr.mxu1 %v423_v20  ;;  %v422_v25 = vld [vmem:[%s1956_s3] sm:$0xff]  ;;  %v52_v26 = vld [vmem:[%s1953_s0 + $0xc8] sm:$0xff] }
  0x11   :  { %1409 = vmatprep.mubr.msk.f32.mxu1 %vm68_vm0, %v49_v18  ;;  %v38_v27 = vld [vmem:[%s1953_s0 + $0x58] sm:$0xff]  ;;  %v53_v28 = vld [vmem:[%s1953_s0 + $0xd0] sm:$0xff]  ;;  %1429 = vmatpush3.msra.mxu1 %v423_v20  ;;  %v39_v29 = vld [vmem:[%s1953_s0 + $0x60] sm:$0xff] }
  0x12   :  { %1386 = vmatmul.mubr.msk.f32.gmra.mxu0 %vm68_vm0, %v34_v17  ;;  %1430 = vmatprep.subr.mxu1 %v422_v25  ;;  %v54_v30 = vld [vmem:[%s1953_s0 + $0xd8] sm:$0xff]  ;;  %v40_v31 = vld [vmem:[%s1953_s0 + $0x68] sm:$0xff]  ;;  %v55_v32 = vld [vmem:[%s1953_s0 + $0xe0] sm:$0xff] }
  0x13   :  { %1388 = vmatprep.mubr.msk.f32.mxu0 %vm68_vm0, %v35_v19  ;;  %1431 = vmatpush3.msra.mxu1 %v422_v25  ;;  %v41_v33 = vld [vmem:[%s1953_s0 + $0x70] sm:$0xff]  ;;  %v56_v34 = vld [vmem:[%s1953_s0 + $0xe8] sm:$0xff]  ;;  %v42_v35 = vld [vmem:[%s1953_s0 + $0x78] sm:$0xff] }
  0x14   :  { %1410 = vmatmul.mubr.msk.f32.gmra.mxu1 %vm68_vm0, %v50_v21  ;;  %v57_v36 = vld [vmem:[%s1953_s0 + $0xf0] sm:$0xff]  ;;  %v58_v37 = vld [vmem:[%s1953_s0 + $0xf8] sm:$0xff]  ;;  %v788_v40 = vld [vmem:[%s1958_s5 + $0x8] sm:$0xff] }
  0x15   :  { %1412 = vmatprep.mubr.msk.f32.mxu1 %vm68_vm0, %v51_v23  ;;  %v790_v38 = vld [vmem:[%s1958_s5 + $0x18] sm:$0xff]  ;;  %v789_v39 = vld [vmem:[%s1958_s5 + $0x10] sm:$0xff]  ;;  %v787_v41 = vld [vmem:[%s1958_s5] sm:$0xff] }
  0x16   :  { %1389 = vmatmul.mubr.msk.f32.gmra.mxu0 %vm68_vm0, %v36_v22  ;;  %1480 = vmatprep.subr.mxu0 %v790_v38  ;;  %v1769_v42 = vld [vmem:[%s1955_s2] ss:$0 sm:$0xff] }
  0x17   :  { %1391 = vmatprep.mubr.msk.f32.mxu0 %vm68_vm0, %v37_v24  ;;  %1481 = vmatpush3.msra.mxu0 %v790_v38 }
  0x18   :  { %1413 = vmatmul.mubr.msk.f32.gmra.mxu1 %vm68_vm0, %v52_v26  ;;  %1482 = vmatprep.subr.mxu0 %v789_v39 }
  0x19   :  { %1415 = vmatprep.mubr.msk.f32.mxu1 %vm68_vm0, %v53_v28  ;;  %1483 = vmatpush3.msra.mxu0 %v789_v39 }
  0x1a   :  { %1392 = vmatmul.mubr.msk.f32.gmra.mxu0 %vm68_vm0, %v38_v27  ;;  %1484 = vmatprep.subr.mxu0 %v788_v40 }
  0x1b   :  { %1394 = vmatprep.mubr.msk.f32.mxu0 %vm68_vm0, %v39_v29  ;;  %1485 = vmatpush3.msra.mxu0 %v788_v40 }
  0x1c   :  { %1416 = vmatmul.mubr.msk.f32.gmra.mxu1 %vm68_vm0, %v54_v30  ;;  %1486 = vmatprep.subr.mxu0 %v787_v41 }
  0x1d   :  { %1418 = vmatprep.mubr.msk.f32.mxu1 %vm68_vm0, %v55_v32  ;;  %1487 = vmatpush3.msra.mxu0 %v787_v41 }
  0x1e   :  { %1395 = vmatmul.mubr.msk.f32.gmra.mxu0 %vm68_vm0, %v40_v31 }
  0x1f   :  { %1397 = vmatprep.mubr.msk.f32.mxu0 %vm68_vm0, %v41_v33 }
  0x20   :  { %1419 = vmatmul.mubr.msk.f32.gmra.mxu1 %vm68_vm0, %v56_v34 }
  0x21   :  { %1421 = vmatprep.mubr.msk.f32.mxu1 %vm68_vm0, %v57_v36 }
  0x22   :  { %1398 = vmatmul.mubr.msk.f32.gmra.mxu0 %vm68_vm0, %v42_v35 }
  0x24   :  { %1422 = vmatmul.mubr.msk.f32.gmra.mxu1 %vm68_vm0, %v58_v37 }
  0xc6   :  { %v1378_v43 = vpop.f32.mrf.mxu0 }
  0xc7   :  { %v237_v44 = vadd.f32 %v1378_v43, %v1769_v42 }
  0xc8   :  { %v231_v45 = vpop.f32.mrf.mxu0  ;;  %v1773_v47 = vpop.f32.mrf.mxu1 }
  0xc9   :  { %v232_v46 = vadd.f32 %v1769_v42, %v231_v45  ;;  %v391_v51 = vmax.f32 %v237_v44, 0.0  ;;  %v317_v40 = vadd.f32 %v1773_v47, %v1769_v42 }
  0xca   :  { %v1381_v48 = vpop.f32.mrf.mxu0  ;;  %v311_v50 = vpop.f32.mrf.mxu1 }
  0xcb   :  { %v390_v49 = vmax.f32 %v232_v46, 0.0  ;;  %v247_v52 = vadd.f32 %v1381_v48, %v1769_v42  ;;  %v312_v30 = vadd.f32 %v1769_v42, %v311_v50  ;;  %v407_v45 = vmax.f32 %v317_v40, 0.0 }
  0xcc   :  { %v241_v53 = vpop.f32.mrf.mxu0  ;;  %v1778_v55 = vpop.f32.mrf.mxu1 }
  0xcd   :  { %v242_v54 = vadd.f32 %v1769_v42, %v241_v53  ;;  %1432 = vmatprep.mubr.msk.f32.mxu1 %vm433_vm1, %v390_v49  ;;  %v393_v59 = vmax.f32 %v247_v52, 0.0  ;;  %v406_v37 = vmax.f32 %v312_v30, 0.0  ;;  %v327_v46 = vadd.f32 %v1778_v55, %v1769_v42 }
  0xce   :  { %v1384_v56 = vpop.f32.mrf.mxu0  ;;  %1433 = vmatmul.mubr.msk.f32.vlgmr.msra.gmra.mxu1 %vm433_vm1, %v391_v51  ;;  %v321_v58 = vpop.f32.mrf.mxu1 }
  0xcf   :  { %v392_v57 = vmax.f32 %v242_v54, 0.0  ;;  %v257_v60 = vadd.f32 %v1384_v56, %v1769_v42  ;;  %v322_v38 = vadd.f32 %v1769_v42, %v321_v58  ;;  %v409_v50 = vmax.f32 %v327_v46, 0.0 }
  0xd0   :  { %v251_v61 = vpop.f32.mrf.mxu0  ;;  %v1784_v63 = vpop.f32.mrf.mxu1 }
  0xd1   :  { %v252_v62 = vadd.f32 %v1769_v42, %v251_v61  ;;  %1435 = vmatprep.mubr.msk.f32.mxu1 %vm433_vm1, %v392_v57  ;;  %v395_v2 = vmax.f32 %v257_v60, 0.0  ;;  %v408_v43 = vmax.f32 %v322_v38, 0.0  ;;  %v337_v51 = vadd.f32 %v1784_v63, %v1769_v42 }
  0xd2   :  { %v1387_v0 = vpop.f32.mrf.mxu0  ;;  %1436 = vmatmul.mubr.msk.f32.gmra.mxu1 %vm433_vm1, %v393_v59  ;;  %v331_v5 = vpop.f32.mrf.mxu1 }
  0xd3   :  { %v394_v1 = vmax.f32 %v252_v62, 0.0  ;;  %v267_v3 = vadd.f32 %v1387_v0, %v1769_v42  ;;  %v332_v44 = vadd.f32 %v1769_v42, %v331_v5  ;;  %v411_v55 = vmax.f32 %v337_v51, 0.0 }
  0xd4   :  { %v261_v4 = vpop.f32.mrf.mxu0  ;;  %v1411_v12 = vpop.f32.mrf.mxu1 }
  0xd5   :  { %v262_v6 = vadd.f32 %v1769_v42, %v261_v4  ;;  %1438 = vmatprep.mubr.msk.f32.mxu1 %vm433_vm1, %v394_v1  ;;  %v397_v9 = vmax.f32 %v267_v3, 0.0  ;;  %v410_v49 = vmax.f32 %v332_v44, 0.0  ;;  %v347_v56 = vadd.f32 %v1411_v12, %v1769_v42  ;;  %v1847_v12 = vld [vmem:[%s1957_s4] ss:$0 sm:$0xff] }
  0xd6   :  { %v1390_v7 = vpop.f32.mrf.mxu0  ;;  %1439 = vmatmul.mubr.msk.f32.gmra.mxu1 %vm433_vm1, %v395_v2  ;;  %v341_v19 = vpop.f32.mrf.mxu1 }
  0xd7   :  { %v396_v8 = vmax.f32 %v262_v6, 0.0  ;;  %v277_v10 = vadd.f32 %v1390_v7, %v1769_v42  ;;  %v342_v47 = vadd.f32 %v1769_v42, %v341_v19  ;;  %v413_v60 = vmax.f32 %v347_v56, 0.0 }
  0xd8   :  { %v271_v11 = vpop.f32.mrf.mxu0  ;;  %v1414_v26 = vpop.f32.mrf.mxu1 }
  0xd9   :  { %v272_v13 = vadd.f32 %v1769_v42, %v271_v11  ;;  %1441 = vmatprep.mubr.msk.f32.mxu1 %vm433_vm1, %v396_v8  ;;  %v399_v16 = vmax.f32 %v277_v10, 0.0  ;;  %v412_v53 = vmax.f32 %v342_v47, 0.0  ;;  %v357_v61 = vadd.f32 %v1414_v26, %v1769_v42 }
  0xda   :  { %v1393_v14 = vpop.f32.mrf.mxu0  ;;  %1442 = vmatmul.mubr.msk.f32.gmra.mxu1 %vm433_vm1, %v397_v9  ;;  %v351_v34 = vpop.f32.mrf.mxu1 }
  0xdb   :  { %v398_v15 = vmax.f32 %v272_v13, 0.0  ;;  %v287_v17 = vadd.f32 %v1393_v14, %v1769_v42  ;;  %v352_v54 = vadd.f32 %v1769_v42, %v351_v34  ;;  %v415_v1 = vmax.f32 %v357_v61, 0.0 }
  0xdc   :  { %v281_v18 = vpop.f32.mrf.mxu0  ;;  %v1417_v41 = vpop.f32.mrf.mxu1 }
  0xdd   :  { %v282_v20 = vadd.f32 %v1769_v42, %v281_v18  ;;  %1444 = vmatprep.mubr.msk.f32.mxu1 %vm433_vm1, %v398_v15  ;;  %v401_v23 = vmax.f32 %v287_v17, 0.0  ;;  %v414_v58 = vmax.f32 %v352_v54, 0.0  ;;  %v367_v2 = vadd.f32 %v1417_v41, %v1769_v42 }
  0xde   :  { %v1396_v21 = vpop.f32.mrf.mxu0  ;;  %1445 = vmatmul.mubr.msk.f32.gmra.mxu1 %vm433_vm1, %v399_v16  ;;  %v361_v48 = vpop.f32.mrf.mxu1 }
  0xdf   :  { %v400_v22 = vmax.f32 %v282_v20, 0.0  ;;  %v297_v24 = vadd.f32 %v1396_v21, %v1769_v42  ;;  %v362_v59 = vadd.f32 %v1769_v42, %v361_v48  ;;  %v417_v6 = vmax.f32 %v367_v2, 0.0 }
  0xe0   :  { %v291_v25 = vpop.f32.mrf.mxu0  ;;  %v1420_v52 = vpop.f32.mrf.mxu1 }
  0xe1   :  { %v292_v27 = vadd.f32 %v1769_v42, %v291_v25  ;;  %1447 = vmatprep.mubr.msk.f32.mxu1 %vm433_vm1, %v400_v22  ;;  %v403_v31 = vmax.f32 %v297_v24, 0.0  ;;  %v416_v63 = vmax.f32 %v362_v59, 0.0  ;;  %v377_v7 = vadd.f32 %v1420_v52, %v1769_v42 }
  0xe2   :  { %v1399_v28 = vpop.f32.mrf.mxu0  ;;  %1448 = vmatmul.mubr.msk.f32.gmra.mxu1 %vm433_vm1, %v401_v23  ;;  %v371_v57 = vpop.f32.mrf.mxu1 }
  0xe3   :  { %v402_v29 = vmax.f32 %v292_v27, 0.0  ;;  %v307_v32 = vadd.f32 %v1399_v28, %v1769_v42  ;;  %v372_v0 = vadd.f32 %v1769_v42, %v371_v57  ;;  %v419_v9 = vmax.f32 %v377_v7, 0.0 }
  0xe4   :  { %v301_v33 = vpop.f32.mrf.mxu0  ;;  %v1423_v62 = vpop.f32.mrf.mxu1 }
  0xe5   :  { %v302_v35 = vadd.f32 %v1769_v42, %v301_v33  ;;  %1450 = vmatprep.mubr.msk.f32.mxu1 %vm433_vm1, %v402_v29  ;;  %v405_v39 = vmax.f32 %v307_v32, 0.0  ;;  %v418_v4 = vmax.f32 %v372_v0, 0.0  ;;  %v387_v10 = vadd.f32 %v1423_v62, %v1769_v42 }
  0xe6   :  { %1451 = vmatmul.mubr.msk.f32.gmra.mxu1 %vm433_vm1, %v403_v31  ;;  %v381_v3 = vpop.f32.mrf.mxu1 }
  0xe7   :  { %v404_v36 = vmax.f32 %v302_v35, 0.0  ;;  %v382_v5 = vadd.f32 %v1769_v42, %v381_v3  ;;  %v421_v11 = vmax.f32 %v387_v10, 0.0 }
  0xe9   :  { %1453 = vmatprep.mubr.msk.f32.mxu1 %vm433_vm1, %v404_v36  ;;  %v420_v8 = vmax.f32 %v382_v5, 0.0 }
  0xea   :  { %1454 = vmatmul.mubr.msk.f32.gmra.mxu1 %vm433_vm1, %v405_v39 }
  0xeb   :  { %1456 = vmatprep.mubr.msk.f32.mxu1 %vm433_vm1, %v406_v37 }
  0xee   :  { %1457 = vmatmul.mubr.msk.f32.gmra.mxu1 %vm433_vm1, %v407_v45 }
  0xef   :  { %1459 = vmatprep.mubr.msk.f32.mxu1 %vm433_vm1, %v408_v43 }
  0xf2   :  { %1460 = vmatmul.mubr.msk.f32.gmra.mxu1 %vm433_vm1, %v409_v50 }
  0xf3   :  { %1462 = vmatprep.mubr.msk.f32.mxu1 %vm433_vm1, %v410_v49 }
  0xf6   :  { %1463 = vmatmul.mubr.msk.f32.gmra.mxu1 %vm433_vm1, %v411_v55 }
  0xf7   :  { %1465 = vmatprep.mubr.msk.f32.mxu1 %vm433_vm1, %v412_v53 }
  0xfa   :  { %1466 = vmatmul.mubr.msk.f32.gmra.mxu1 %vm433_vm1, %v413_v60 }
  0xfb   :  { %1468 = vmatprep.mubr.msk.f32.mxu1 %vm433_vm1, %v414_v58 }
  0xfe   :  { %1469 = vmatmul.mubr.msk.f32.gmra.mxu1 %vm433_vm1, %v415_v1 }
  0xff   :  { %1471 = vmatprep.mubr.msk.f32.mxu1 %vm433_vm1, %v416_v63 }
 0x102   :  { %1472 = vmatmul.mubr.msk.f32.gmra.mxu1 %vm433_vm1, %v417_v6 }
 0x103   :  { %1474 = vmatprep.mubr.msk.f32.mxu1 %vm433_vm1, %v418_v4 }
 0x106   :  { %1475 = vmatmul.mubr.msk.f32.gmra.mxu1 %vm433_vm1, %v419_v9 }
 0x107   :  { %1477 = vmatprep.mubr.msk.f32.mxu1 %vm433_vm1, %v420_v8 }
 0x10a   :  { %1478 = vmatmul.mubr.msk.f32.gmra.mxu1 %vm433_vm1, %v421_v11 }
 0x18e   :  { %v1434_v13 = vpop.f32.mrf.mxu1 }
 0x18f   :  { %v602_v14 = vadd.f32 %v1434_v13, %v1847_v12 }
 0x190   :  { %v596_v15 = vpop.f32.mrf.mxu1 }
 0x191   :  { %v597_v16 = vadd.f32 %v1847_v12, %v596_v15  ;;  %v756_v18 = vmax.f32 %v602_v14, 0.0 }
 0x192   :  { %v1437_v17 = vpop.f32.mrf.mxu1 }
 0x193   :  { %v755_v42 = vmax.f32 %v597_v16, 0.0  ;;  %v612_v19 = vadd.f32 %v1437_v17, %v1847_v12 }
 0x194   :  { %v606_v20 = vpop.f32.mrf.mxu1 }
 0x195   :  { %v607_v21 = vadd.f32 %v1847_v12, %v606_v20  ;;  %1488 = vmatprep.mubr.msk.f32.mxu0 %vm433_vm1, %v755_v42  ;;  %v758_v24 = vmax.f32 %v612_v19, 0.0 }
 0x196   :  { %v1440_v22 = vpop.f32.mrf.mxu1  ;;  %1489 = vmatmul.mubr.msk.f32.vlgmr.msra.gmra.mxu0 %vm433_vm1, %v756_v18 }
 0x197   :  { %v757_v23 = vmax.f32 %v607_v21, 0.0  ;;  %v622_v25 = vadd.f32 %v1440_v22, %v1847_v12 }
 0x198   :  { %v616_v26 = vpop.f32.mrf.mxu1 }
 0x199   :  { %v617_v27 = vadd.f32 %v1847_v12, %v616_v26  ;;  %1491 = vmatprep.mubr.msk.f32.mxu0 %vm433_vm1, %v757_v23  ;;  %v760_v30 = vmax.f32 %v622_v25, 0.0 }
 0x19a   :  { %v1443_v28 = vpop.f32.mrf.mxu1  ;;  %1492 = vmatmul.mubr.msk.f32.gmra.mxu0 %vm433_vm1, %v758_v24 }
 0x19b   :  { %v759_v29 = vmax.f32 %v617_v27, 0.0  ;;  %v632_v31 = vadd.f32 %v1443_v28, %v1847_v12 }
 0x19c   :  { %v626_v32 = vpop.f32.mrf.mxu1 }
 0x19d   :  { %v627_v33 = vadd.f32 %v1847_v12, %v626_v32  ;;  %1494 = vmatprep.mubr.msk.f32.mxu0 %vm433_vm1, %v759_v29  ;;  %v762_v36 = vmax.f32 %v632_v31, 0.0 }
 0x19e   :  { %v1446_v34 = vpop.f32.mrf.mxu1  ;;  %1495 = vmatmul.mubr.msk.f32.gmra.mxu0 %vm433_vm1, %v760_v30 }
 0x19f   :  { %v761_v35 = vmax.f32 %v627_v33, 0.0  ;;  %v642_v37 = vadd.f32 %v1446_v34, %v1847_v12 }
 0x1a0   :  { %v636_v38 = vpop.f32.mrf.mxu1 }
 0x1a1   :  { %v637_v39 = vadd.f32 %v1847_v12, %v636_v38  ;;  %1497 = vmatprep.mubr.msk.f32.mxu0 %vm433_vm1, %v761_v35  ;;  %v764_v43 = vmax.f32 %v642_v37, 0.0 }
 0x1a2   :  { %v1449_v40 = vpop.f32.mrf.mxu1  ;;  %1498 = vmatmul.mubr.msk.f32.gmra.mxu0 %vm433_vm1, %v762_v36 }
 0x1a3   :  { %v763_v41 = vmax.f32 %v637_v39, 0.0  ;;  %v652_v44 = vadd.f32 %v1449_v40, %v1847_v12 }
 0x1a4   :  { %v646_v45 = vpop.f32.mrf.mxu1 }
 0x1a5   :  { %v647_v46 = vadd.f32 %v1847_v12, %v646_v45  ;;  %1500 = vmatprep.mubr.msk.f32.mxu0 %vm433_vm1, %v763_v41  ;;  %v766_v47 = vmax.f32 %v652_v44, 0.0 }
 0x1a6   :  { %v1452_v48 = vpop.f32.mrf.mxu1  ;;  %1501 = vmatmul.mubr.msk.f32.gmra.mxu0 %vm433_vm1, %v764_v43 }
 0x1a7   :  { %v765_v49 = vmax.f32 %v647_v46, 0.0  ;;  %v662_v50 = vadd.f32 %v1452_v48, %v1847_v12  ;;  %v1916_v46 = vld [vmem:[%s1959_s6] ss:$0 sm:$0xff]  ;;  %s1565_s6 = smov [#allocation2]  }
 0x1a8   :  { %v656_v51 = vpop.f32.mrf.mxu1  ;;  %s1156_s12 = sshll.u32 %s1565_s6, 4  ;;  %s1157_s12 = int_to_ptr.vmem [resolvable:$true] %s1156_s12 }
 0x1a9   :  { %v657_v52 = vadd.f32 %v1847_v12, %v656_v51  ;;  %1503 = vmatprep.mubr.msk.f32.mxu0 %vm433_vm1, %v765_v49  ;;  %v768_v55 = vmax.f32 %v662_v50, 0.0  ;;  %s1543_s13 = scalar_lea.vmem %s1157_s12, 4096  ;;  %p1548_p1 = scmp.lt.s32.totalorder %s1157_s12, %s1157_s12 }
 0x1aa   :  { %v1455_v53 = vpop.f32.mrf.mxu1  ;;  %1504 = vmatmul.mubr.msk.f32.gmra.mxu0 %vm433_vm1, %v766_v47  ;;  %p1544_p0 = scmp.ne.s32.totalorder %s1157_s12, %s1543_s13  ;;  %p1549_p2 = scmp.lt.s32.totalorder %s1543_s13, %s1543_s13 }
 0x1ab   :  { %v767_v54 = vmax.f32 %v657_v52, 0.0  ;;  %v672_v56 = vadd.f32 %v1455_v53, %v1847_v12 }
 0x1ac   :  { %v666_v57 = vpop.f32.mrf.mxu1  ;;  %p1550_p3 = por %p1549_p2, %p1548_p1 }
 0x1ad   :  { %v667_v58 = vadd.f32 %v1847_v12, %v666_v57  ;;  %1506 = vmatprep.mubr.msk.f32.mxu0 %vm433_vm1, %v767_v54  ;;  %v770_v61 = vmax.f32 %v672_v56, 0.0 }
 0x1ae   :  { %v1458_v59 = vpop.f32.mrf.mxu1  ;;  %1507 = vmatmul.mubr.msk.f32.gmra.mxu0 %vm433_vm1, %v768_v55  ;;  %p1551_p4 = pnand %p1550_p3, %p1544_p0 }
 0x1af   :  { %v769_v60 = vmax.f32 %v667_v58, 0.0  ;;  %v682_v62 = vadd.f32 %v1458_v59, %v1847_v12 }
 0x1b0   :  { %v676_v63 = vpop.f32.mrf.mxu1 }
 0x1b1   :  { %v677_v0 = vadd.f32 %v1847_v12, %v676_v63  ;;  %1509 = vmatprep.mubr.msk.f32.mxu0 %vm433_vm1, %v769_v60  ;;  %v772_v3 = vmax.f32 %v682_v62, 0.0 }
 0x1b2   :  { %v1461_v1 = vpop.f32.mrf.mxu1  ;;  %1510 = vmatmul.mubr.msk.f32.gmra.mxu0 %vm433_vm1, %v770_v61 }
 0x1b3   :  { %v771_v2 = vmax.f32 %v677_v0, 0.0  ;;  %v692_v4 = vadd.f32 %v1461_v1, %v1847_v12 }
 0x1b4   :  { %v686_v5 = vpop.f32.mrf.mxu1 }
 0x1b5   :  { %v687_v6 = vadd.f32 %v1847_v12, %v686_v5  ;;  %1512 = vmatprep.mubr.msk.f32.mxu0 %vm433_vm1, %v771_v2  ;;  %v774_v9 = vmax.f32 %v692_v4, 0.0 }
 0x1b6   :  { %v1464_v7 = vpop.f32.mrf.mxu1  ;;  %1513 = vmatmul.mubr.msk.f32.gmra.mxu0 %vm433_vm1, %v772_v3 }
 0x1b7   :  { %v773_v8 = vmax.f32 %v687_v6, 0.0  ;;  %v702_v10 = vadd.f32 %v1464_v7, %v1847_v12 }
 0x1b8   :  { %v696_v11 = vpop.f32.mrf.mxu1 }
 0x1b9   :  { %v697_v13 = vadd.f32 %v1847_v12, %v696_v11  ;;  %1515 = vmatprep.mubr.msk.f32.mxu0 %vm433_vm1, %v773_v8  ;;  %v776_v16 = vmax.f32 %v702_v10, 0.0 }
 0x1ba   :  { %v1467_v14 = vpop.f32.mrf.mxu1  ;;  %1516 = vmatmul.mubr.msk.f32.gmra.mxu0 %vm433_vm1, %v774_v9 }
 0x1bb   :  { %v775_v15 = vmax.f32 %v697_v13, 0.0  ;;  %v712_v17 = vadd.f32 %v1467_v14, %v1847_v12 }
 0x1bc   :  { %v706_v42 = vpop.f32.mrf.mxu1 }
 0x1bd   :  { %v707_v18 = vadd.f32 %v1847_v12, %v706_v42  ;;  %1518 = vmatprep.mubr.msk.f32.mxu0 %vm433_vm1, %v775_v15  ;;  %v778_v21 = vmax.f32 %v712_v17, 0.0 }
 0x1be   :  { %v1470_v19 = vpop.f32.mrf.mxu1  ;;  %1519 = vmatmul.mubr.msk.f32.gmra.mxu0 %vm433_vm1, %v776_v16 }
 0x1bf   :  { %v777_v20 = vmax.f32 %v707_v18, 0.0  ;;  %v722_v22 = vadd.f32 %v1470_v19, %v1847_v12 }
 0x1c0   :  { %v716_v23 = vpop.f32.mrf.mxu1 }
 0x1c1   :  { %v717_v24 = vadd.f32 %v1847_v12, %v716_v23  ;;  %1521 = vmatprep.mubr.msk.f32.mxu0 %vm433_vm1, %v777_v20  ;;  %v780_v27 = vmax.f32 %v722_v22, 0.0 }
 0x1c2   :  { %v1473_v25 = vpop.f32.mrf.mxu1  ;;  %1522 = vmatmul.mubr.msk.f32.gmra.mxu0 %vm433_vm1, %v778_v21 }
 0x1c3   :  { %v779_v26 = vmax.f32 %v717_v24, 0.0  ;;  %v732_v28 = vadd.f32 %v1473_v25, %v1847_v12 }
 0x1c4   :  { %v726_v29 = vpop.f32.mrf.mxu1 }
 0x1c5   :  { %v727_v30 = vadd.f32 %v1847_v12, %v726_v29  ;;  %1524 = vmatprep.mubr.msk.f32.mxu0 %vm433_vm1, %v779_v26  ;;  %v782_v33 = vmax.f32 %v732_v28, 0.0 }
 0x1c6   :  { %v1476_v31 = vpop.f32.mrf.mxu1  ;;  %1525 = vmatmul.mubr.msk.f32.gmra.mxu0 %vm433_vm1, %v780_v27 }
 0x1c7   :  { %v781_v32 = vmax.f32 %v727_v30, 0.0  ;;  %v742_v34 = vadd.f32 %v1476_v31, %v1847_v12 }
 0x1c8   :  { %v736_v35 = vpop.f32.mrf.mxu1 }
 0x1c9   :  { %v737_v36 = vadd.f32 %v1847_v12, %v736_v35  ;;  %1527 = vmatprep.mubr.msk.f32.mxu0 %vm433_vm1, %v781_v32  ;;  %v784_v39 = vmax.f32 %v742_v34, 0.0 }
 0x1ca   :  { %v1479_v37 = vpop.f32.mrf.mxu1  ;;  %1528 = vmatmul.mubr.msk.f32.gmra.mxu0 %vm433_vm1, %v782_v33 }
 0x1cb   :  { %v783_v38 = vmax.f32 %v737_v36, 0.0  ;;  %v752_v40 = vadd.f32 %v1479_v37, %v1847_v12 }
 0x1cc   :  { %v746_v41 = vpop.f32.mrf.mxu1 }
 0x1cd   :  { %v747_v43 = vadd.f32 %v1847_v12, %v746_v41  ;;  %1530 = vmatprep.mubr.msk.f32.mxu0 %vm433_vm1, %v783_v38  ;;  %v786_v45 = vmax.f32 %v752_v40, 0.0 }
 0x1ce   :  { %1531 = vmatmul.mubr.msk.f32.gmra.mxu0 %vm433_vm1, %v784_v39 }
 0x1cf   :  { %v785_v44 = vmax.f32 %v747_v43, 0.0 }
 0x1d1   :  { %1533 = vmatprep.mubr.msk.f32.mxu0 %vm433_vm1, %v785_v44 }
 0x1d2   :  { %1534 = vmatmul.mubr.msk.f32.gmra.mxu0 %vm433_vm1, %v786_v45 }
 0x256   :  { %v1490_v48 = vpop.f32.mrf.mxu0 }
 0x257   :  { %v966_v49 = vadd.f32 %v1490_v48, %v1916_v46 }
 0x258   :  { %v960_v47 = vpop.f32.mrf.mxu0 }
 0x259   :  { %1120 = vst [vmem:[#allocation2 + $0x8] sm:$0xff] %v966_v49  ;;  %v961_v12 = vadd.f32 %v1916_v46, %v960_v47 }
 0x25a   :  { %v1493_v50 = vpop.f32.mrf.mxu0 }
 0x25b   :  { %1119 = vst [vmem:[#allocation2] sm:$0xff] %v961_v12  ;;  %v976_v51 = vadd.f32 %v1493_v50, %v1916_v46 }
 0x25c   :  { %v970_v52 = vpop.f32.mrf.mxu0 }
 0x25d   :  { %1122 = vst [vmem:[#allocation2 + $0x18] sm:$0xff] %v976_v51  ;;  %v971_v53 = vadd.f32 %v1916_v46, %v970_v52 }
 0x25e   :  { %v1496_v54 = vpop.f32.mrf.mxu0 }
 0x25f   :  { %1121 = vst [vmem:[#allocation2 + $0x10] sm:$0xff] %v971_v53  ;;  %v986_v55 = vadd.f32 %v1496_v54, %v1916_v46 }
 0x260   :  { %v980_v56 = vpop.f32.mrf.mxu0 }
 0x261   :  { %1124 = vst [vmem:[#allocation2 + $0x28] sm:$0xff] %v986_v55  ;;  %v981_v57 = vadd.f32 %v1916_v46, %v980_v56 }
 0x262   :  { %v1499_v58 = vpop.f32.mrf.mxu0 }
 0x263   :  { %1123 = vst [vmem:[#allocation2 + $0x20] sm:$0xff] %v981_v57  ;;  %v996_v59 = vadd.f32 %v1499_v58, %v1916_v46 }
 0x264   :  { %v990_v60 = vpop.f32.mrf.mxu0 }
 0x265   :  { %1126 = vst [vmem:[#allocation2 + $0x38] sm:$0xff] %v996_v59  ;;  %v991_v61 = vadd.f32 %v1916_v46, %v990_v60 }
 0x266   :  { %v1502_v62 = vpop.f32.mrf.mxu0 }
 0x267   :  { %1125 = vst [vmem:[#allocation2 + $0x30] sm:$0xff] %v991_v61  ;;  %v1006_v63 = vadd.f32 %v1502_v62, %v1916_v46 }
 0x268   :  { %v1000_v0 = vpop.f32.mrf.mxu0 }
 0x269   :  { %1128 = vst [vmem:[#allocation2 + $0x48] sm:$0xff] %v1006_v63  ;;  %v1001_v1 = vadd.f32 %v1916_v46, %v1000_v0 }
 0x26a   :  { %v1505_v2 = vpop.f32.mrf.mxu0 }
 0x26b   :  { %1127 = vst [vmem:[#allocation2 + $0x40] sm:$0xff] %v1001_v1  ;;  %v1016_v3 = vadd.f32 %v1505_v2, %v1916_v46 }
 0x26c   :  { %v1010_v4 = vpop.f32.mrf.mxu0 }
 0x26d   :  { %1130 = vst [vmem:[#allocation2 + $0x58] sm:$0xff] %v1016_v3  ;;  %v1011_v5 = vadd.f32 %v1916_v46, %v1010_v4 }
 0x26e   :  { %v1508_v6 = vpop.f32.mrf.mxu0 }
 0x26f   :  { %1129 = vst [vmem:[#allocation2 + $0x50] sm:$0xff] %v1011_v5  ;;  %v1026_v7 = vadd.f32 %v1508_v6, %v1916_v46 }
 0x270   :  { %v1020_v8 = vpop.f32.mrf.mxu0 }
 0x271   :  { %1132 = vst [vmem:[#allocation2 + $0x68] sm:$0xff] %v1026_v7  ;;  %v1021_v9 = vadd.f32 %v1916_v46, %v1020_v8 }
 0x272   :  { %v1511_v10 = vpop.f32.mrf.mxu0 }
 0x273   :  { %1131 = vst [vmem:[#allocation2 + $0x60] sm:$0xff] %v1021_v9  ;;  %v1036_v11 = vadd.f32 %v1511_v10, %v1916_v46 }
 0x274   :  { %v1030_v13 = vpop.f32.mrf.mxu0 }
 0x275   :  { %1134 = vst [vmem:[#allocation2 + $0x78] sm:$0xff] %v1036_v11  ;;  %v1031_v14 = vadd.f32 %v1916_v46, %v1030_v13 }
 0x276   :  { %v1514_v15 = vpop.f32.mrf.mxu0 }
 0x277   :  { %1133 = vst [vmem:[#allocation2 + $0x70] sm:$0xff] %v1031_v14  ;;  %v1046_v16 = vadd.f32 %v1514_v15, %v1916_v46 }
 0x278   :  { %v1040_v17 = vpop.f32.mrf.mxu0 }
 0x279   :  { %1136 = vst [vmem:[#allocation2 + $0x88] sm:$0xff] %v1046_v16  ;;  %v1041_v42 = vadd.f32 %v1916_v46, %v1040_v17 }
 0x27a   :  { %v1517_v18 = vpop.f32.mrf.mxu0 }
 0x27b   :  { %1135 = vst [vmem:[#allocation2 + $0x80] sm:$0xff] %v1041_v42  ;;  %v1056_v19 = vadd.f32 %v1517_v18, %v1916_v46 }
 0x27c   :  { %v1050_v20 = vpop.f32.mrf.mxu0 }
 0x27d   :  { %1138 = vst [vmem:[#allocation2 + $0x98] sm:$0xff] %v1056_v19  ;;  %v1051_v21 = vadd.f32 %v1916_v46, %v1050_v20 }
 0x27e   :  { %v1520_v22 = vpop.f32.mrf.mxu0 }
 0x27f   :  { %1137 = vst [vmem:[#allocation2 + $0x90] sm:$0xff] %v1051_v21  ;;  %v1066_v23 = vadd.f32 %v1520_v22, %v1916_v46 }
 0x280   :  { %v1060_v24 = vpop.f32.mrf.mxu0 }
 0x281   :  { %1140 = vst [vmem:[#allocation2 + $0xa8] sm:$0xff] %v1066_v23  ;;  %v1061_v25 = vadd.f32 %v1916_v46, %v1060_v24 }
 0x282   :  { %v1523_v26 = vpop.f32.mrf.mxu0 }
 0x283   :  { %1139 = vst [vmem:[#allocation2 + $0xa0] sm:$0xff] %v1061_v25  ;;  %v1076_v27 = vadd.f32 %v1523_v26, %v1916_v46 }
 0x284   :  { %v1070_v28 = vpop.f32.mrf.mxu0 }
 0x285   :  { %1142 = vst [vmem:[#allocation2 + $0xb8] sm:$0xff] %v1076_v27  ;;  %v1071_v29 = vadd.f32 %v1916_v46, %v1070_v28 }
 0x286   :  { %v1526_v30 = vpop.f32.mrf.mxu0 }
 0x287   :  { %1141 = vst [vmem:[#allocation2 + $0xb0] sm:$0xff] %v1071_v29  ;;  %v1086_v31 = vadd.f32 %v1526_v30, %v1916_v46 }
 0x288   :  { %v1080_v32 = vpop.f32.mrf.mxu0 }
 0x289   :  { %1144 = vst [vmem:[#allocation2 + $0xc8] sm:$0xff] %v1086_v31  ;;  %v1081_v33 = vadd.f32 %v1916_v46, %v1080_v32 }
 0x28a   :  { %v1529_v34 = vpop.f32.mrf.mxu0 }
 0x28b   :  { %1143 = vst [vmem:[#allocation2 + $0xc0] sm:$0xff] %v1081_v33  ;;  %v1096_v35 = vadd.f32 %v1529_v34, %v1916_v46 }
 0x28c   :  { %v1090_v36 = vpop.f32.mrf.mxu0 }
 0x28d   :  { %1146 = vst [vmem:[#allocation2 + $0xd8] sm:$0xff] %v1096_v35  ;;  %v1091_v37 = vadd.f32 %v1916_v46, %v1090_v36 }
 0x28e   :  { %v1532_v38 = vpop.f32.mrf.mxu0 }
 0x28f   :  { %1145 = vst [vmem:[#allocation2 + $0xd0] sm:$0xff] %v1091_v37  ;;  %v1106_v39 = vadd.f32 %v1532_v38, %v1916_v46 }
 0x290   :  { %v1100_v40 = vpop.f32.mrf.mxu0 }
 0x291   :  { %1148 = vst [vmem:[#allocation2 + $0xe8] sm:$0xff] %v1106_v39  ;;  %v1101_v41 = vadd.f32 %v1916_v46, %v1100_v40 }
 0x292   :  { %v1535_v43 = vpop.f32.mrf.mxu0 }
 0x293   :  { %1147 = vst [vmem:[#allocation2 + $0xe0] sm:$0xff] %v1101_v41  ;;  %v1116_v44 = vadd.f32 %v1535_v43, %v1916_v46 }
 0x294   :  { %v1110_v45 = vpop.f32.mrf.mxu0 }
 0x295   :  { %1150 = vst [vmem:[#allocation2 + $0xf8] sm:$0xff] %v1116_v44  ;;  %v1111_v48 = vadd.f32 %v1916_v46, %v1110_v45 }
 0x297   :  { %1149 = vst [vmem:[#allocation2 + $0xf0] sm:$0xff] %v1111_v48 }
 0x298   :  { %1554 = shalt.err (!%p1551_p4)
}
 0x299   :  { %s1566_s14 = smov 128   ;;  %s1567_s15 = smov 8  }
 0x29a   :  { %1162 = dma.vmem_to_hbm [thread:$0]  %s1157_s12, 4096, %s1960_s7, [#allocation3], %s1566_s14, %s1566_s14, %s1567_s15  }
 0x29b   :  { %1563 = dma.done.wait [#allocation3], 4096  }
 0x29c   :  { %1564 = vsyncadd [#allocation3], 4294963200 }
 0x29d   :  { %1166 = vsyncpa [#allocation3], 1 }

</bundles_post_ra>
